<compile_context>
chip_gen: v5e
topology: v5e:2x2
jax: 0.10.0
libtpu: 0.0.40
codegen_flags: <defaults>
</compile_context>

<pallas_src>
import functools
import math

import jax
import jax.numpy as jnp
from jax import lax
from jax.experimental import pallas as pl
from jax.experimental.pallas import tpu as pltpu

EPS = 1e-5
FEAT = 1280
HID = 32


def _round_up(n, m):
    return ((n + m - 1) // m) * m


def _pick_hw_tile(hw_pad, target=2048):
    """Largest multiple of 128 that divides hw_pad and is <= target."""
    if hw_pad <= target:
        return hw_pad
    best = 128
    t = 128
    while t <= target:
        if hw_pad % t == 0:
            best = t
        t += 128
    return best


def _fused_kernel(x_ref, ws_ref, bs_ref, w1_ref, b1_ref, w2_ref, b2_ref,
                  out_ref, gap_acc, feat_acc, *, inv_hw):
    c = pl.program_id(1)            # channel index (reduction)
    k = pl.program_id(2)            # spatial-tile index (reduction)
    kh = pl.num_programs(2)
    n_chan = ws_ref.shape[0]        # static

    @pl.when(k == 0)
    def _():
        gap_acc[...] = jnp.zeros_like(gap_acc)

    @pl.when(jnp.logical_and(c == 0, k == 0))
    def _():
        feat_acc[...] = jnp.zeros_like(feat_acc)

    # ---- streamed spatial sum for this (batch tile, channel, hw tile) ----
    x_tile = x_ref[...].astype(jnp.float32)                   # [TB, HW_T]
    gap_acc[...] += jnp.sum(x_tile, axis=-1, keepdims=True)   # f32 accumulation

    # ---- end of this channel: fold its GAP into the stem projection (VPU) ----
    @pl.when(k == kh - 1)
    def _():
        chan_ids = lax.broadcasted_iota(jnp.int32, (n_chan, 1), 0)
        ws_row = jnp.sum(jnp.where(chan_ids == c, ws_ref[...], 0.0),
                         axis=0, keepdims=True)                # [1, FEAT]
        feat_acc[...] += gap_acc[...] * ws_row                 # [TB, FEAT]

    # ---- last reduction step for this batch tile: classifier epilogue ----
    @pl.when(jnp.logical_and(c == n_chan - 1, k == kh - 1))
    def _():
        feat = feat_acc[...] * inv_hw + bs_ref[...]            # GAP mean + stem bias
        feat = feat * jax.nn.sigmoid(feat)                     # SiLU
        # Linear(1280, 32) with eval-mode BatchNorm folded into w1/b1.
        h = jnp.dot(feat, w1_ref[...],
                    preferred_element_type=jnp.float32) + b1_ref[...]
        # Exact (erf) GELU, matching nn.GELU() default.
        h = 0.5 * h * (1.0 + lax.erf(h * (1.0 / math.sqrt(2.0))))
        # Linear(32, 1) as VPU multiply + lane reduce (skip an N=1 MXU matmul).
        out = jnp.sum(h * w2_ref[...], axis=-1, keepdims=True) + b2_ref[0]
        out_ref[...] = out.astype(out_ref.dtype)


def trading_value_forward(x_nchw, params):
    """x_nchw: [B, C, H, W] float32. Returns [B, 1] float32."""
    (w_stem, b_stem, w1, b1, bn_g, bn_b, bn_m, bn_v, w2, b2) = params
    B, C, H, W = x_nchw.shape
    HW = H * W

    # ---- fold eval-mode BatchNorm1d(32) into Linear(1280, 32) ----
    scale = bn_g * lax.rsqrt(bn_v + EPS)            # [1, HID]
    w1f = w1 * scale                                # [FEAT, HID]
    b1f = (b1 - bn_m) * scale + bn_b                # [1, HID]
    w2row = w2.reshape(1, HID)                      # [1, HID] (VPU row)
    b2s = b2.reshape(1)                             # scalar -> SMEM

    # ---- tiling: batch tiles x channels x spatial tiles ----
    if B <= 128:
        b_pad = _round_up(B, 16)
        tb = b_pad
    else:
        tb = 128
        b_pad = _round_up(B, 128)
    hw_pad = _round_up(HW, 128)
    hw_t = _pick_hw_tile(hw_pad)                    # <= 2048 lanes per step
    kh = hw_pad // hw_t
    nbt = b_pad // tb

    # Free reshape to [B, C, HW]; zero-pad batch/spatial (zeros don't change the
    # spatial sum; we divide by the true HW). Stream x as bf16 to halve HBM bytes.
    x3 = x_nchw.reshape(B, C, HW)
    x3 = jnp.pad(x3, ((0, b_pad - B), (0, 0), (0, hw_pad - HW)))
    x2 = x3.reshape(b_pad, C * hw_pad).astype(jnp.bfloat16)

    def _vmem_full(arr):
        zeros = (0,) * arr.ndim
        return pl.BlockSpec(arr.shape, lambda i, c, k, _z=zeros: _z)

    out_padded = pl.pallas_call(
        functools.partial(_fused_kernel, inv_hw=1.0 / HW),
        out_shape=jax.ShapeDtypeStruct((b_pad, 1), jnp.float32),
        grid_spec=pltpu.PrefetchScalarGridSpec(
            num_scalar_prefetch=0,
            grid=(nbt, C, kh),
            in_specs=[
                # x: (TB, HW_T) tiles, column-block = c*kh + k within [B, C*HW].
                pl.BlockSpec((tb, hw_t),
                             lambda i, c, k, _kh=kh: (i, c * _kh + k)),
                _vmem_full(w_stem),      # [C, 1280]  stem projection
                _vmem_full(b_stem),      # [1, 1280]
                _vmem_full(w1f),         # [1280, 32] BN-folded
                _vmem_full(b1f),         # [1, 32]    BN-folded
                _vmem_full(w2row),       # [1, 32]
                pl.BlockSpec(memory_space=pltpu.MemorySpace.SMEM),   # b2 scalar
            ],
            out_specs=pl.BlockSpec((tb, 1), lambda i, c, k: (i, 0)),
            scratch_shapes=[
                pltpu.VMEM((tb, 1), jnp.float32),      # per-channel GAP accum
                pltpu.VMEM((tb, FEAT), jnp.float32),   # stem feature accum
            ],
        ),
        compiler_params=pltpu.CompilerParams(
            dimension_semantics=("parallel", "arbitrary", "arbitrary"),
            vmem_limit_bytes=32 * 1024 * 1024,
        ),
    )(x2, w_stem, b_stem, w1f, b1f, w2row, b2s)

    return out_padded[:B]


def init_params(key, in_channels):
    ks = jax.random.split(key, 4)
    # backbone stand-in projection C -> 1280
    w_stem = (jax.random.normal(ks[0], (in_channels, FEAT), jnp.float32)
              / math.sqrt(in_channels))
    b_stem = jnp.zeros((1, FEAT), jnp.float32)
    # Classifier: Linear(1280, 32)
    w1 = (jax.random.normal(ks[1], (FEAT, HID), jnp.float32) / math.sqrt(FEAT))
    b1 = jnp.zeros((1, HID), jnp.float32)
    # BatchNorm1d(32) parameters / running stats (fresh init)
    bn_gamma = jnp.ones((1, HID), jnp.float32)
    bn_beta = jnp.zeros((1, HID), jnp.float32)
    bn_mean = jnp.zeros((1, HID), jnp.float32)
    bn_var = jnp.ones((1, HID), jnp.float32)
    # Linear(32, 1)
    w2 = (jax.random.normal(ks[2], (HID, 1), jnp.float32) / math.sqrt(HID))
    b2 = jnp.zeros((1, 1), jnp.float32)
    return (w_stem, b_stem, w1, b1, bn_gamma, bn_beta, bn_mean, bn_var, w2, b2)


def reference_forward(x_nchw, params):
    (w_stem, b_stem, w1, b1, g, be, m, v, w2, b2) = params
    B, C, H, W = x_nchw.shape
    gap = jnp.mean(x_nchw.reshape(B, C, H * W), axis=-1)
    feat = gap @ w_stem + b_stem
    feat = feat * jax.nn.sigmoid(feat)
    h = feat @ w1 + b1
    h = (h - m) * lax.rsqrt(v + EPS) * g + be
    h = 0.5 * h * (1.0 + lax.erf(h / jnp.sqrt(2.0)))
    return h @ w2 + b2


if __name__ == "__main__":
    key = jax.random.PRNGKey(0)
    k_x, k_p = jax.random.split(key)

    B, C, H, W = 2, 3, 16, 16
    x = jax.random.normal(k_x, (B, C, H, W), jnp.float32)
    params = init_params(k_p, C)

    out = trading_value_forward(x, params)
    out = jax.block_until_ready(out)

    # Reference sees the same bf16-rounded input the kernel streams.
    x_bf16 = x.astype(jnp.bfloat16).astype(jnp.float32)
    ref = reference_forward(x_bf16, params)

    assert out.shape == (B, 1)
    assert jnp.allclose(out, ref, atol=2e-3, rtol=2e-2), (out, ref)

    print("KERNEL_OK")
</pallas_src>

<mosaic_0001>
module attributes {stable_mosaic.version = 11 : i64} {
  func.func @_fused_kernel(%arg0: i32, %arg1: i32, %arg2: i32, %arg3: memref<16x256xbf16, #tpu.memory_space<vmem>>, %arg4: memref<3x1280xf32, #tpu.memory_space<vmem>>, %arg5: memref<1x1280xf32, #tpu.memory_space<vmem>>, %arg6: memref<1280x32xf32, #tpu.memory_space<vmem>>, %arg7: memref<1x32xf32, #tpu.memory_space<vmem>>, %arg8: memref<1x32xf32, #tpu.memory_space<vmem>>, %arg9: memref<1xf32, #tpu.memory_space<smem>>, %arg10: memref<16x1xf32, #tpu.memory_space<vmem>>, %arg11: memref<16x1xf32, #tpu.memory_space<vmem>>, %arg12: memref<16x1280xf32, #tpu.memory_space<vmem>>) attributes {dimension_semantics = [#tpu.dimension_semantics<parallel>, #tpu.dimension_semantics<arbitrary>, #tpu.dimension_semantics<arbitrary>], iteration_bounds = array<i64: 1, 3, 1>, scalar_prefetch = 0 : i64, scratch_operands = 2 : i64, tpu.core_type = #tpu.core_type<tc>, window_params = [{transform_indices = @transform_0, window_bounds = array<i64: 16, 256>}, {pipeline_mode = #tpu.pipeline_mode<synchronous>, transform_indices = @transform_1, window_bounds = array<i64: 3, 1280>}, {pipeline_mode = #tpu.pipeline_mode<synchronous>, transform_indices = @transform_2, window_bounds = array<i64: 1, 1280>}, {pipeline_mode = #tpu.pipeline_mode<synchronous>, transform_indices = @transform_3, window_bounds = array<i64: 1280, 32>}, {pipeline_mode = #tpu.pipeline_mode<synchronous>, transform_indices = @transform_4, window_bounds = array<i64: 1, 32>}, {pipeline_mode = #tpu.pipeline_mode<synchronous>, transform_indices = @transform_5, window_bounds = array<i64: 1, 32>}, {transform_indices = @transform_6, window_bounds = array<i64: 1>}, {transform_indices = @transform_7, window_bounds = array<i64: 16, 1>}]} {
    %c0_i32 = arith.constant 0 : i32
    %0 = arith.cmpi eq, %arg2, %c0_i32 : i32
    %1 = arith.extui %0 : i1 to i32
    %c0_i32_0 = arith.constant 0 : i32
    %2 = arith.cmpi ne, %1, %c0_i32_0 : i32
    scf.if %2 {
      %cst_13 = arith.constant 0.000000e+00 : f32
      %23 = vector.broadcast %cst_13 : f32 to vector<16x1xf32>
      %c0_14 = arith.constant 0 : index
      %c0_15 = arith.constant 0 : index
      %24 = vector.load %arg11[%c0_14, %c0_15] : memref<16x1xf32, #tpu.memory_space<vmem>>, vector<16x1xf32>
      tpu.vector_store %arg11[%c0_14, %c0_15], %23 {strides = array<i32>} : memref<16x1xf32, #tpu.memory_space<vmem>>, vector<16x1xf32>,
    } else {
    }
    %c0_i32_1 = arith.constant 0 : i32
    %3 = arith.cmpi eq, %arg1, %c0_i32_1 : i32
    %c0_i32_2 = arith.constant 0 : i32
    %4 = arith.cmpi eq, %arg2, %c0_i32_2 : i32
    %5 = arith.andi %3, %4 : i1
    %6 = arith.extui %5 : i1 to i32
    %c0_i32_3 = arith.constant 0 : i32
    %7 = arith.cmpi ne, %6, %c0_i32_3 : i32
    scf.if %7 {
      %cst_13 = arith.constant 0.000000e+00 : f32
      %23 = vector.broadcast %cst_13 : f32 to vector<16x1280xf32>
      %c0_14 = arith.constant 0 : index
      %c0_15 = arith.constant 0 : index
      %24 = vector.load %arg12[%c0_14, %c0_15] : memref<16x1280xf32, #tpu.memory_space<vmem>>, vector<16x1280xf32>
      tpu.vector_store %arg12[%c0_14, %c0_15], %23 {strides = array<i32>} : memref<16x1280xf32, #tpu.memory_space<vmem>>, vector<16x1280xf32>,
    } else {
    }
    %c0 = arith.constant 0 : index
    %c0_4 = arith.constant 0 : index
    %8 = vector.load %arg3[%c0, %c0_4] : memref<16x256xbf16, #tpu.memory_space<vmem>>, vector<16x256xbf16>
    %9 = arith.extf %8 : vector<16x256xbf16> to vector<16x256xf32>
    %c0_5 = arith.constant 0 : index
    %c0_6 = arith.constant 0 : index
    %10 = vector.load %arg11[%c0_5, %c0_6] : memref<16x1xf32, #tpu.memory_space<vmem>>, vector<16x1xf32>
    %cst = arith.constant dense<0.000000e+00> : vector<16xf32>
    %11 = vector.multi_reduction <add>, %9, %cst [1] : vector<16x256xf32> to vector<16xf32>
    %12 = vector.shape_cast %11 : vector<16xf32> to vector<16x1xf32>
    %13 = arith.addf %10, %12 : vector<16x1xf32>
    %c0_7 = arith.constant 0 : index
    %c0_8 = arith.constant 0 : index
    %14 = vector.load %arg11[%c0_7, %c0_8] : memref<16x1xf32, #tpu.memory_space<vmem>>, vector<16x1xf32>
    tpu.vector_store %arg11[%c0_7, %c0_8], %13 {strides = array<i32>} : memref<16x1xf32, #tpu.memory_space<vmem>>, vector<16x1xf32>,
    %c0_i32_9 = arith.constant 0 : i32
    %15 = arith.cmpi eq, %arg2, %c0_i32_9 : i32
    %16 = arith.extui %15 : i1 to i32
    %c0_i32_10 = arith.constant 0 : i32
    %17 = arith.cmpi ne, %16, %c0_i32_10 : i32
    scf.if %17 {
      %23 = tpu.iota {dimensions = array<i32: 0>} : vector<3x1xi32>
      %24 = vector.broadcast %arg1 : i32 to vector<3x1xi32>
      %25 = arith.cmpi eq, %23, %24 : vector<3x1xi32>
      %c0_13 = arith.constant 0 : index
      %c0_14 = arith.constant 0 : index
      %26 = vector.load %arg4[%c0_13, %c0_14] : memref<3x1280xf32, #tpu.memory_space<vmem>>, vector<3x1280xf32>
      %cst_15 = arith.constant 0.000000e+00 : f32
      %27 = vector.shape_cast %25 : vector<3x1xi1> to vector<3x1xi1>
      %28 = vector.broadcast %27 : vector<3x1xi1> to vector<3x1280xi1>
      %29 = vector.broadcast %cst_15 : f32 to vector<3x1280xf32>
      %30 = arith.select %28, %26, %29 : vector<3x1280xi1>, vector<3x1280xf32>
      %cst_16 = arith.constant dense<0.000000e+00> : vector<1280xf32>
      %31 = vector.multi_reduction <add>, %30, %cst_16 [0] : vector<3x1280xf32> to vector<1280xf32>
      %32 = vector.shape_cast %31 : vector<1280xf32> to vector<1x1280xf32>
      %c0_17 = arith.constant 0 : index
      %c0_18 = arith.constant 0 : index
      %33 = vector.load %arg12[%c0_17, %c0_18] : memref<16x1280xf32, #tpu.memory_space<vmem>>, vector<16x1280xf32>
      %c0_19 = arith.constant 0 : index
      %c0_20 = arith.constant 0 : index
      %34 = vector.load %arg11[%c0_19, %c0_20] : memref<16x1xf32, #tpu.memory_space<vmem>>, vector<16x1xf32>
      %35 = vector.broadcast %34 : vector<16x1xf32> to vector<16x1280xf32>
      %36 = vector.broadcast %32 : vector<1x1280xf32> to vector<16x1280xf32>
      %37 = arith.mulf %35, %36 : vector<16x1280xf32>
      %38 = arith.addf %33, %37 : vector<16x1280xf32>
      %c0_21 = arith.constant 0 : index
      %c0_22 = arith.constant 0 : index
      %39 = vector.load %arg12[%c0_21, %c0_22] : memref<16x1280xf32, #tpu.memory_space<vmem>>, vector<16x1280xf32>
      tpu.vector_store %arg12[%c0_21, %c0_22], %38 {strides = array<i32>} : memref<16x1280xf32, #tpu.memory_space<vmem>>, vector<16x1280xf32>,
    } else {
    }
    %c2_i32 = arith.constant 2 : i32
    %18 = arith.cmpi eq, %arg1, %c2_i32 : i32
    %c0_i32_11 = arith.constant 0 : i32
    %19 = arith.cmpi eq, %arg2, %c0_i32_11 : i32
    %20 = arith.andi %18, %19 : i1
    %21 = arith.extui %20 : i1 to i32
    %c0_i32_12 = arith.constant 0 : i32
    %22 = arith.cmpi ne, %21, %c0_i32_12 : i32
    scf.if %22 {
      %c0_13 = arith.constant 0 : index
      %c0_14 = arith.constant 0 : index
      %23 = vector.load %arg12[%c0_13, %c0_14] : memref<16x1280xf32, #tpu.memory_space<vmem>>, vector<16x1280xf32>
      %cst_15 = arith.constant 3.906250e-03 : f32
      %24 = vector.broadcast %cst_15 : f32 to vector<16x1280xf32>
      %25 = arith.mulf %23, %24 : vector<16x1280xf32>
      %c0_16 = arith.constant 0 : index
      %c0_17 = arith.constant 0 : index
      %26 = vector.load %arg5[%c0_16, %c0_17] : memref<1x1280xf32, #tpu.memory_space<vmem>>, vector<1x1280xf32>
      %27 = vector.broadcast %26 : vector<1x1280xf32> to vector<16x1280xf32>
      %28 = arith.addf %25, %27 : vector<16x1280xf32>
      %29 = arith.negf %28 : vector<16x1280xf32>
      %30 = math.exp %29 : vector<16x1280xf32>
      %cst_18 = arith.constant 1.000000e+00 : f32
      %31 = vector.broadcast %cst_18 : f32 to vector<16x1280xf32>
      %32 = arith.addf %31, %30 : vector<16x1280xf32>
      %33 = arith.divf %31, %32 : vector<16x1280xf32>
      %34 = arith.mulf %28, %33 : vector<16x1280xf32>
      %c0_19 = arith.constant 0 : index
      %c0_20 = arith.constant 0 : index
      %35 = vector.load %arg6[%c0_19, %c0_20] : memref<1280x32xf32, #tpu.memory_space<vmem>>, vector<1280x32xf32>
      %cst_21 = arith.constant dense<0.000000e+00> : vector<16x32xf32>
      %36 = tpu.matmul %34, %35, %cst_21 {dimension_numbers = #tpu.dot_dimension_numbers<[1], [0], [0], [1], [0, 0, 1, 1], [], []>} : vector<16x1280xf32>, vector<1280x32xf32>, vector<16x32xf32> -> vector<16x32xf32>
      %c0_22 = arith.constant 0 : index
      %c0_23 = arith.constant 0 : index
      %37 = vector.load %arg7[%c0_22, %c0_23] : memref<1x32xf32, #tpu.memory_space<vmem>>, vector<1x32xf32>
      %38 = vector.broadcast %37 : vector<1x32xf32> to vector<16x32xf32>
      %39 = arith.addf %36, %38 : vector<16x32xf32>
      %cst_24 = arith.constant 5.000000e-01 : f32
      %40 = vector.broadcast %cst_24 : f32 to vector<16x32xf32>
      %41 = arith.mulf %40, %39 : vector<16x32xf32>
      %cst_25 = arith.constant 0.707106769 : f32
      %42 = vector.broadcast %cst_25 : f32 to vector<16x32xf32>
      %43 = arith.mulf %39, %42 : vector<16x32xf32>
      %44 = math.erf %43 : vector<16x32xf32>
      %cst_26 = arith.constant 1.000000e+00 : f32
      %45 = vector.broadcast %cst_26 : f32 to vector<16x32xf32>
      %46 = arith.addf %45, %44 : vector<16x32xf32>
      %47 = arith.mulf %41, %46 : vector<16x32xf32>
      %c0_27 = arith.constant 0 : index
      %c0_28 = arith.constant 0 : index
      %48 = vector.load %arg8[%c0_27, %c0_28] : memref<1x32xf32, #tpu.memory_space<vmem>>, vector<1x32xf32>
      %49 = vector.broadcast %48 : vector<1x32xf32> to vector<16x32xf32>
      %50 = arith.mulf %47, %49 : vector<16x32xf32>
      %cst_29 = arith.constant dense<0.000000e+00> : vector<16xf32>
      %51 = vector.multi_reduction <add>, %50, %cst_29 [1] : vector<16x32xf32> to vector<16xf32>
      %52 = vector.shape_cast %51 : vector<16xf32> to vector<16x1xf32>
      %c0_30 = arith.constant 0 : index
      %53 = memref.load %arg9[%c0_30] : memref<1xf32, #tpu.memory_space<smem>>
      %54 = vector.broadcast %53 : f32 to vector<16x1xf32>
      %55 = arith.addf %52, %54 : vector<16x1xf32>
      %c0_31 = arith.constant 0 : index
      %c0_32 = arith.constant 0 : index
      %56 = vector.load %arg10[%c0_31, %c0_32] : memref<16x1xf32, #tpu.memory_space<vmem>>, vector<16x1xf32>
      tpu.vector_store %arg10[%c0_31, %c0_32], %55 {strides = array<i32>} : memref<16x1xf32, #tpu.memory_space<vmem>>, vector<16x1xf32>,
    } else {
    }
    return
  }
  func.func @transform_0(%arg0: i32, %arg1: i32, %arg2: i32) -> (i32, i32) {
    %c1_i32 = arith.constant 1 : i32
    %0 = arith.muli %arg1, %c1_i32 : i32
    %1 = arith.addi %0, %arg2 : i32
    %c0_i32 = arith.constant 0 : i32
    return %arg0, %1 : i32, i32
  }
  func.func @transform_1(%arg0: i32, %arg1: i32, %arg2: i32) -> (i32, i32) {
    %c0_i32 = arith.constant 0 : i32
    %c0_i32_0 = arith.constant 0 : i32
    %c0_i32_1 = arith.constant 0 : i32
    return %c0_i32, %c0_i32_0 : i32, i32
  }
  func.func @transform_2(%arg0: i32, %arg1: i32, %arg2: i32) -> (i32, i32) {
    %c0_i32 = arith.constant 0 : i32
    %c0_i32_0 = arith.constant 0 : i32
    %c0_i32_1 = arith.constant 0 : i32
    return %c0_i32, %c0_i32_0 : i32, i32
  }
  func.func @transform_3(%arg0: i32, %arg1: i32, %arg2: i32) -> (i32, i32) {
    %c0_i32 = arith.constant 0 : i32
    %c0_i32_0 = arith.constant 0 : i32
    %c0_i32_1 = arith.constant 0 : i32
    return %c0_i32, %c0_i32_0 : i32, i32
  }
  func.func @transform_4(%arg0: i32, %arg1: i32, %arg2: i32) -> (i32, i32) {
    %c0_i32 = arith.constant 0 : i32
    %c0_i32_0 = arith.constant 0 : i32
    %c0_i32_1 = arith.constant 0 : i32
    return %c0_i32, %c0_i32_0 : i32, i32
  }
  func.func @transform_5(%arg0: i32, %arg1: i32, %arg2: i32) -> (i32, i32) {
    %c0_i32 = arith.constant 0 : i32
    %c0_i32_0 = arith.constant 0 : i32
    %c0_i32_1 = arith.constant 0 : i32
    return %c0_i32, %c0_i32_0 : i32, i32
  }
  func.func @transform_6(%arg0: i32, %arg1: i32, %arg2: i32) -> i32 {
    %c0_i32 = arith.constant 0 : i32
    %c0_i32_0 = arith.constant 0 : i32
    return %c0_i32 : i32
  }
  func.func @transform_7(%arg0: i32, %arg1: i32, %arg2: i32) -> (i32, i32) {
    %c0_i32 = arith.constant 0 : i32
    %c0_i32_0 = arith.constant 0 : i32
    return %arg0, %c0_i32 : i32, i32
  }
}

</mosaic_0001>

<bundles_post_ra>
// kernel: tpu_custom_call.1
= control target key start
LH: loop header
LB: loop body
LE: loop exit
PB: predicated region body
PF: predicated region fallthrough
CT: control target
= control target key end

     0   :  { %s3232_s0 = inlined_call_operand.vmem [shape: bf16[16,768], index: 0, kind: input, shape index: {}]   ;;  %s3233_s1 = inlined_call_operand.vmem [shape: f32[3,1280], index: 1, kind: input, shape index: {}]   ;;  %s3234_s2 = inlined_call_operand.vmem [shape: f32[1,1280], index: 2, kind: input, shape index: {}]   ;;  %s3235_s3 = inlined_call_operand.vmem [shape: f32[1280,32], index: 3, kind: input, shape index: {}]   ;;  %s3236_s4 = inlined_call_operand.vmem [shape: f32[1,32], index: 4, kind: input, shape index: {}]   ;;  %s3237_s5 = inlined_call_operand.vmem [shape: f32[1,32], index: 5, kind: input, shape index: {}]   ;;  %s3238_s6 = inlined_call_operand.<no memory space> [shape: f32[1], index: 6, kind: input, shape index: {}]   ;;  %s3239_s7 = inlined_call_operand.vmem [shape: f32[16,1], index: 7, kind: output, shape index: {}]  }
   0x1   :  { %12 = sst [smem:[#allocation4]] %s3238_s6 }
   0x2   :  { %s1975_s26 = smov 0   ;;  %s1977_s27 = smov 0  }
   0x3   :  { %s1979_s28 = smov 0   ;;  %s1981_s29 = smov 0  }
   0x4   :  { %s1983_s30 = smov 0  }
   0x5 LB: > { %s33_s6 = sadd.s32 1, %s1923_s29  ;;  %p55_p1 = scmp.ne.s32.totalorder %s1915_s27, %s1911_s26  ;;  %s1927_s30 = sphi %s1983_s30, %s18_s30   ;;  %s1923_s29 = sphi %s1981_s29, %s3313_s29   ;;  %s1919_s28 = sphi %s1979_s28, %s3312_s28   ;;  %s1915_s27 = sphi %s1977_s27, %s3311_s27   ;;  %s1911_s26 = sphi %s1975_s26, %s3310_s26  }
   0x6   : > { %p35_p0 = scmp.ge.s32.totalorder %s33_s6, 3  ;;  %p56_p2 = scmp.eq.s32.totalorder %s1927_s30, 0 }
   0x7   : > { %s48_s9 = sadd.s32 1, %s1915_s27  ;;  %p1689_p5 = scmp.ge.s32.totalorder %s1927_s30, 3 }
   0x8   : > { %s3315_s6 = smov (%p35_p0, %s33_s6), 0  ;;  %p57_p3 = por %p56_p2, %p55_p1 }
   0x9   : > { %s44_s8 = ssub.s32 %s1923_s29, %s3315_s6  ;;  %251 = sbr.rel (%p1689_p5) target bundleno = 20 (0x14), region = 40 }
   0xa   : > { %p46_p4 = scmp.eq.s32.totalorder %s44_s8, 0 }
   0xc   : > { %s2010_s10 = scalar_select %p46_p4, %s1915_s27, %s48_s9  }
   0xe   : > { %254 = sbr.rel (!%p57_p3) target bundleno = 20 (0x14), region = 44  ;;  %s256_s11 = sand.u32 (%p57_p3), 1, %s1915_s27  }
   0xf   : > { %s1723_s12 = sshll.u32 (%p57_p3), %s1923_s29, 3  ;;  %s1690_s13 = sshll.u32 (%p57_p3), %s256_s11, 4 }
  0x10   : > { %s265_s16 = scalar_lea.vmem (%p57_p3), %s3232_s0, %s1723_s12  ;;  %s258_s17 = scalar_lea.vmem (%p57_p3), [#allocation5], %s1690_s13 }
  0x11   : > { %v296_v0 = vld [vmem:[%s265_s16] sm:$0xff] (%p57_p3)  ;;  %v298_v1 = vld [vmem:[%s265_s16 + $0x18] sm:$0xff] (%p57_p3) }
  0x12   : > { %297 = vst [vmem:[%s258_s17] sm:$0xff] (%p57_p3), %v296_v0 }
  0x13   : > { %299 = vst [vmem:[%s258_s17 + $0x8] sm:$0xff] %v298_v1 }
  0x14 PF: > { %p1693_p6 = scmp.ge.s32.totalorder %s1927_s30, 1  ;;  %p304_p7 = scmp.lt.s32.totalorder %s1927_s30, 4 }
  0x16   : > { %p305_p8 = pnand %p1693_p6, %p304_p7 }
  0x17   : > { %s311_s18 = sand.u32 (!%p305_p8), 1, %s1911_s26   ;;  %p358_p9 = scmp.eq.s32.totalorder (!%p305_p8), %s1919_s28, 0 }
  0x18   : > { %308 = sbr.rel (%p305_p8) target bundleno = 761 (0x2f9), region = 82  ;;  %s2022_s19 = sshll.u32 (!%p305_p8), %s311_s18, 4 }
  0x19   : > { %s313_s20 = scalar_lea.vmem (!%p305_p8), [#allocation5], %s2022_s19 }
  0x1d   : > { %vm3240_vm0 = vcmask 7168   ;;  %v1929_v2 = vmov 0.0   ;;  %362 = sbr.rel (!%p358_p9) target bundleno = 52 (0x34), region = 94  ;;  %v1930_v3 = vmov (%p358_p9), 0.0  }
  0x1e   : > { %356 = vst.msk [vmem:[#allocation2] sm:$0xff] %vm3240_vm0, %v1929_v2 }
  0x1f   : > { %357 = vst.msk [vmem:[#allocation2 + $0x8] sm:$0xff] %vm3240_vm0, %v1929_v2 }
  0x20   : > { %363 = vst [vmem:[#allocation3] sm:$0xff] (%p358_p9), %v1930_v3 }
  0x21   : > { %364 = vst [vmem:[#allocation3 + $0x38] sm:$0xff] (%p358_p9), %v1930_v3 }
  0x22   : > { %365 = vst [vmem:[#allocation3 + $0x50] sm:$0xff] %v1930_v3 }
  0x23   : > { %366 = vst [vmem:[#allocation3 + $0x18] sm:$0xff] %v1930_v3 }
  0x24   : > { %367 = vst [vmem:[#allocation3 + $0x30] sm:$0xff] %v1930_v3 }
  0x25   : > { %368 = vst [vmem:[#allocation3 + $0x68] sm:$0xff] %v1930_v3 }
  0x26   : > { %369 = vst [vmem:[#allocation3 + $0x78] sm:$0xff] %v1930_v3 }
  0x27   : > { %370 = vst [vmem:[#allocation3 + $0x80] sm:$0xff] %v1930_v3 }
  0x28   : > { %371 = vst [vmem:[#allocation3 + $0x8] sm:$0xff] %v1930_v3 }
  0x29   : > { %372 = vst [vmem:[#allocation3 + $0x88] sm:$0xff] %v1930_v3 }
  0x2a   : > { %373 = vst [vmem:[#allocation3 + $0x28] sm:$0xff] %v1930_v3 }
  0x2b   : > { %374 = vst [vmem:[#allocation3 + $0x40] sm:$0xff] %v1930_v3 }
  0x2c   : > { %375 = vst [vmem:[#allocation3 + $0x58] sm:$0xff] %v1930_v3 }
  0x2d   : > { %376 = vst [vmem:[#allocation3 + $0x10] sm:$0xff] %v1930_v3 }
  0x2e   : > { %377 = vst [vmem:[#allocation3 + $0x98] sm:$0xff] %v1930_v3 }
  0x2f   : > { %378 = vst [vmem:[#allocation3 + $0x60] sm:$0xff] %v1930_v3 }
  0x30   : > { %379 = vst [vmem:[#allocation3 + $0x20] sm:$0xff] %v1930_v3 }
  0x31   : > { %380 = vst [vmem:[#allocation3 + $0x48] sm:$0xff] %v1930_v3 }
  0x32   : > { %381 = vst [vmem:[#allocation3 + $0x70] sm:$0xff] %v1930_v3 }
  0x33   : > { %382 = vst [vmem:[#allocation3 + $0x90] sm:$0xff] %v1930_v3 }
  0x34 PF: > { %v383_v4 = vld [vmem:[%s313_s20] sm:$0xff]  ;;  %v384_v7 = vld [vmem:[%s313_s20 + $0x8] sm:$0xff]  ;;  %v1931_v12 = vmov 0   ;;  %p622_p10 = scmp.eq.s32.totalorder %s1919_s28, 2  ;;  %v405_v28 = vlaneseq  ;;  %v407_v30 = vstv %s1919_s28  ;;  %vm459_vm2 = vcmask 1042432  }
  0x35   : > { %v385_v5 = vunpack.c.l.bf16 %v383_v4  ;;  %v386_v6 = vunpack.c.h.bf16 %v383_v4  ;;  %v387_v9 = vunpack.c.l.bf16 %v384_v7  ;;  %v388_v10 = vunpack.c.h.bf16 %v384_v7  ;;  %1801 = vset.pattern.permute.xlu1 %v1931_v12  ;;  %1802 = vset.pattern.permute.xlu0 %v1931_v12  ;;  %v409_v21 = vld [vmem:[%s3233_s1] sm:$0x77]  ;;  %v410_v22 = vld [vmem:[%s3233_s1 + $0x8] sm:$0x77]  ;;  %v411_v23 = vld [vmem:[%s3233_s1 + $0x10] sm:$0x77] }
  0x36   : > { %421 = vst [vmem:[#allocation1] ss:$2 sm:$0xff] %v409_v21  ;;  %v412_v24 = vld [vmem:[%s3233_s1 + $0x18] sm:$0x77]  ;;  %v413_v25 = vld [vmem:[%s3233_s1 + $0x20] sm:$0x77] }
  0x37   : > { %v391_v8 = vadd.f32 %v386_v6, %v385_v5  ;;  %v394_v11 = vadd.f32 %v388_v10, %v387_v9  ;;  %v389_v13 = vld [vmem:[#allocation2] sm:$0xff]  ;;  %423 = vst [vmem:[#allocation1 + $0x10] ss:$2 sm:$0xff] %v410_v22  ;;  %v406_v29 = vshrl.u32 %v405_v28, 7  ;;  %s1606_s18 = sld [smem:[#allocation4]] (%p622_p10) }
  0x38   : > { %v390_v16 = vld [vmem:[#allocation2 + $0x8] sm:$0xff]  ;;  %425 = vst [vmem:[#allocation1 + $0x20] ss:$2 sm:$0xff] %v411_v23 }
  0x39   : > { %392 = vadd.xlane.f32.xlu0 %v391_v8  ;;  %427 = vst [vmem:[#allocation1 + $0x30] ss:$2 sm:$0xff] %v412_v24  ;;  %vm2046_vm1 = vcmp.eq.s32.totalorder %v406_v29, %v407_v30 }
  0x3d   : > { %v428_v26 = vld.sshfl [vmem:[#allocation1] sm:$0xff pattern:$0x75316420]  ;;  %v429_v27 = vld.sshfl [vmem:[#allocation1 + $0x8] sm:$0xff pattern:$0x75316420] }
  0x3e   : > { %436 = vst [vmem:[#allocation1] ss:$2 sm:$0xff] %v413_v25  ;;  %v430_v32 = vld.sshfl [vmem:[#allocation1 + $0x10] sm:$0xff pattern:$0x75316420]  ;;  %v449_v38 = vsel %vm2046_vm1, %v428_v26, 0.0 }
  0x3f   : > { %v431_v33 = vld.sshfl [vmem:[#allocation1 + $0x18] sm:$0xff pattern:$0x75316420]  ;;  %v432_v34 = vld.sshfl [vmem:[#allocation1 + $0x20] sm:$0xff pattern:$0x75316420] }
  0x40   : > { %v433_v35 = vld.sshfl [vmem:[#allocation1 + $0x28] sm:$0xff pattern:$0x75316420]  ;;  %v434_v36 = vld.sshfl [vmem:[#allocation1 + $0x30] sm:$0xff pattern:$0x75316420] }
  0x41   : > { %395 = vadd.xlane.f32.xlu0 %v394_v11  ;;  %v435_v37 = vld.sshfl [vmem:[#allocation1 + $0x38] sm:$0xff pattern:$0x75316420]  ;;  %v450_v39 = vsel %vm2046_vm1, %v429_v27, 0.0  ;;  %v451_v41 = vsel %vm2046_vm1, %v430_v32, 0.0  ;;  %v452_v42 = vsel %vm2046_vm1, %v431_v33, 0.0 }
  0x42   : > { %v453_v43 = vsel %vm2046_vm1, %v432_v34, 0.0  ;;  %v454_v44 = vsel %vm2046_vm1, %v433_v35, 0.0  ;;  %v455_v46 = vsel %vm2046_vm1, %v434_v36, 0.0  ;;  %v460_v47 = vsel %vm459_vm2, %v449_v38, 0.0 }
  0x43   : > { %v467_v48 = vsel %vm459_vm2, %v450_v39, 0.0  ;;  %v456_v49 = vsel %vm2046_vm1, %v435_v37, 0.0  ;;  %v474_v51 = vsel %vm459_vm2, %v451_v41, 0.0  ;;  %v481_v52 = vsel %vm459_vm2, %v452_v42, 0.0 }
  0x44   : > { %v488_v53 = vsel %vm459_vm2, %v453_v43, 0.0  ;;  %v495_v54 = vsel %vm459_vm2, %v454_v44, 0.0  ;;  %v461_v56 = vrot.slane %v460_v47, 4  ;;  %v468_v57 = vrot.slane %v467_v48, 4 }
  0x45   : > { %v437_v40 = vld.sshfl [vmem:[#allocation1] sm:$0xff pattern:$0x75316420]  ;;  %v438_v45 = vld.sshfl [vmem:[#allocation1 + $0x8] sm:$0xff pattern:$0x75316420] }
  0x46   : > { %v457_v50 = vsel %vm2046_vm1, %v437_v40, 0.0  ;;  %v458_v55 = vsel %vm2046_vm1, %v438_v45, 0.0  ;;  %v502_v58 = vsel %vm459_vm2, %v455_v46, 0.0  ;;  %v475_v59 = vrot.slane %v474_v51, 4 }
  0x47   : > { %v482_v60 = vrot.slane %v481_v52, 4  ;;  %v509_v61 = vsel %vm459_vm2, %v456_v49, 0.0  ;;  %v516_v62 = vsel %vm459_vm2, %v457_v50, 0.0  ;;  %v489_v63 = vrot.slane %v488_v53, 4 }
  0x48   : > { %v496_v0 = vrot.slane %v495_v54, 4  ;;  %v503_v1 = vrot.slane %v502_v58, 4  ;;  %v523_v2 = vsel %vm459_vm2, %v458_v55, 0.0  ;;  %v510_v3 = vrot.slane %v509_v61, 4 }
  0x49   : > { %v517_v4 = vrot.slane %v516_v62, 4  ;;  %v462_v5 = vadd.f32 %v461_v56, %v460_v47  ;;  %v469_v6 = vadd.f32 %v468_v57, %v467_v48  ;;  %v476_v7 = vadd.f32 %v475_v59, %v474_v51  ;;  %v530_v56 = vld [vmem:[#allocation3] sm:$0xff]  ;;  %v531_v57 = vld [vmem:[#allocation3 + $0x38] sm:$0xff] }
  0x4a   : > { %v483_v8 = vadd.f32 %v482_v60, %v481_v52  ;;  %v490_v9 = vadd.f32 %v489_v63, %v488_v53  ;;  %v497_v10 = vadd.f32 %v496_v0, %v495_v54  ;;  %v524_v11 = vrot.slane %v523_v2, 4  ;;  %v533_v59 = vld [vmem:[#allocation3 + $0x18] sm:$0xff] }
  0x4b   : > { %v504_v12 = vadd.f32 %v503_v1, %v502_v58  ;;  %v532_v58 = vld [vmem:[#allocation3 + $0x50] sm:$0xff] }
  0x4c   : > { %v525_v21 = vadd.f32 %v524_v11, %v523_v2  ;;  %v534_v1 = vld [vmem:[#allocation3 + $0x30] sm:$0xff] }
  0x4d   : > { %v505_v22 = vrot.slane %v504_v12, 2 }
  0x4e   : > { %v526_v31 = vrot.slane %v525_v21, 2 }
  0x4f   : > { %v506_v32 = vadd.f32 %v505_v22, %v504_v12  ;;  %v537_v12 = vld [vmem:[#allocation3 + $0x80] sm:$0xff] }
  0x50   : > { %v527_v41 = vadd.f32 %v526_v31, %v525_v21  ;;  %v543_v31 = vld [vmem:[#allocation3 + $0x10] sm:$0xff] }
  0x51   : > { %v507_v42 = vrot.slane %v506_v32, 1 }
  0x52   : > { %v528_v51 = vrot.slane %v527_v41, 1 }
  0x53   : > { %v508_v52 = vadd.f32 %v507_v42, %v506_v32 }
  0x54   : > { %v529_v0 = vadd.f32 %v528_v51, %v527_v41 }
  0xac   : > { %v393_v14 = vpop.xlane.xlu0 %392 }
  0xad   : > { %v397_v15 = vadd.f32 %v393_v14, %v389_v13  ;;  %v511_v13 = vadd.f32 %v510_v3, %v509_v61  ;;  %v518_v14 = vadd.f32 %v517_v4, %v516_v62  ;;  %v535_v4 = vld [vmem:[#allocation3 + $0x68] sm:$0xff] }
  0xaf   : > { %400 = vst.msk [vmem:[#allocation2] sm:$0xff] %vm3240_vm0, %v397_v15  ;;  %v463_v15 = vrot.slane %v462_v5, 2  ;;  %v512_v23 = vrot.slane %v511_v13, 2  ;;  %v519_v24 = vrot.slane %v518_v14, 2 }
  0xb1   : > { %v464_v25 = vadd.f32 %v463_v15, %v462_v5  ;;  %v513_v33 = vadd.f32 %v512_v23, %v511_v13  ;;  %v520_v34 = vadd.f32 %v519_v24, %v518_v14  ;;  %v538_v15 = vld [vmem:[#allocation3 + $0x8] sm:$0xff]  ;;  %v541_v23 = vld [vmem:[#allocation3 + $0x40] sm:$0xff] }
  0xb3   : > { %v465_v35 = vrot.slane %v464_v25, 1  ;;  %v514_v43 = vrot.slane %v513_v33, 1  ;;  %v521_v44 = vrot.slane %v520_v34, 1 }
  0xb4   : > { %v396_v17 = vpop.xlane.xlu0 %395 }
  0xb5   : > { %v398_v18 = vadd.f32 %v396_v17, %v390_v16  ;;  %v470_v16 = vrot.slane %v469_v6, 2  ;;  %v477_v17 = vrot.slane %v476_v7, 2  ;;  %v466_v45 = vadd.f32 %v465_v35, %v464_v25 }
  0xb6   : > { %v550_v19 = vld [vmem:[#allocation2] sm:$0xff]  ;;  %v515_v54 = vadd.f32 %v514_v43, %v513_v33  ;;  %v2080_v55 = vadd.f32 %v521_v44, %v520_v34  ;;  %v544_v34 = vld [vmem:[#allocation3 + $0x98] sm:$0xff]  ;;  %v547_v43 = vld [vmem:[#allocation3 + $0x48] sm:$0xff] }
  0xb7   : > { %401 = vst.msk [vmem:[#allocation2 + $0x8] sm:$0xff] %vm3240_vm0, %v398_v18  ;;  %554 = vperm.xlu1 %1801, %v550_v19   ;;  %v484_v18 = vrot.slane %v483_v8, 2  ;;  %v491_v19 = vrot.slane %v490_v9, 2  ;;  %v471_v26 = vadd.f32 %v470_v16, %v469_v6  ;;  %v478_v27 = vadd.f32 %v477_v17, %v476_v7 }
  0xb9   : > { %v485_v28 = vadd.f32 %v484_v18, %v483_v8  ;;  %v492_v29 = vadd.f32 %v491_v19, %v490_v9  ;;  %v472_v36 = vrot.slane %v471_v26, 1  ;;  %v479_v37 = vrot.slane %v478_v27, 1  ;;  %v536_v8 = vld [vmem:[#allocation3 + $0x78] sm:$0xff]  ;;  %v539_v18 = vld [vmem:[#allocation3 + $0x88] sm:$0xff] }
  0xbb   : > { %v486_v38 = vrot.slane %v485_v28, 1  ;;  %v493_v39 = vrot.slane %v492_v29, 1  ;;  %v473_v46 = vadd.f32 %v472_v36, %v471_v26  ;;  %v480_v47 = vadd.f32 %v479_v37, %v478_v27  ;;  %v545_v37 = vld [vmem:[#allocation3 + $0x60] sm:$0xff] }
  0xbd   : > { %v487_v48 = vadd.f32 %v486_v38, %v485_v28  ;;  %v494_v49 = vadd.f32 %v493_v39, %v492_v29  ;;  %v542_v28 = vld [vmem:[#allocation3 + $0x58] sm:$0xff] }
  0xbe   : > { %v551_v20 = vld [vmem:[#allocation2 + $0x8] sm:$0xff] }
  0xbf   : > { %559 = vperm.xlu1 %1801, %v551_v20   ;;  %v498_v20 = vrot.slane %v497_v10, 2 }
  0xc1   : > { %v499_v30 = vadd.f32 %v498_v20, %v497_v10  ;;  %v540_v20 = vld [vmem:[#allocation3 + $0x28] sm:$0xff] }
  0xc3   : > { %v500_v40 = vrot.slane %v499_v30, 1 }
  0xc5   : > { %v501_v50 = vadd.f32 %v500_v40, %v499_v30  ;;  %v546_v40 = vld [vmem:[#allocation3 + $0x20] sm:$0xff] }
 0x129   : > { %v555_v53 = vpop.permute.xlu1 %554 }
 0x12a   : > { %v562_v60 = vmul.f32 %v555_v53, %v466_v45  ;;  %v563_v61 = vmul.f32 %v555_v53, %v473_v46  ;;  %v564_v62 = vmul.f32 %v555_v53, %v480_v47  ;;  %v565_v63 = vmul.f32 %v555_v53, %v487_v48 }
 0x12b   : > { %v566_v2 = vmul.f32 %v555_v53, %v494_v49  ;;  %v567_v3 = vmul.f32 %v555_v53, %v501_v50  ;;  %v568_v5 = vmul.f32 %v555_v53, %v508_v52  ;;  %v569_v9 = vmul.f32 %v555_v53, %v515_v54 }
 0x12c   : > { %v582_v6 = vadd.f32 %v562_v60, %v530_v56  ;;  %v583_v7 = vadd.f32 %v563_v61, %v531_v57  ;;  %v584_v10 = vadd.f32 %v564_v62, %v532_v58  ;;  %v585_v11 = vadd.f32 %v565_v63, %v533_v59  ;;  %v1125_v56 = vld [vmem:[%s3235_s3 + $0x70] sm:$0xff] (%p622_p10)  ;;  %v1142_v57 = vld [vmem:[%s3235_s3 + $0xf8] sm:$0xff] (%p622_p10)  ;;  %v1124_v60 = vld [vmem:[%s3235_s3 + $0x68] sm:$0xff] (%p622_p10) }
 0x12d   : > { %v570_v13 = vmul.f32 %v555_v53, %v2080_v55  ;;  %v586_v14 = vadd.f32 %v566_v2, %v534_v1  ;;  %v571_v16 = vmul.f32 %v555_v53, %v529_v0  ;;  %v587_v17 = vadd.f32 %v567_v3, %v535_v4  ;;  %v1157_v58 = vld [vmem:[%s3235_s3 + $0x170] sm:$0xff] (%p622_p10)  ;;  %v1174_v59 = vld [vmem:[%s3235_s3 + $0x1f8] sm:$0xff] (%p622_p10)  ;;  %1298 = vmatpush.msra.mxu1 (%p622_p10), %v1142_v57  ;;  %v1156_v62 = vld [vmem:[%s3235_s3 + $0x168] sm:$0xff] (%p622_p10) }
 0x12e   : > { %602 = vst [vmem:[#allocation3] sm:$0xff] %v582_v6  ;;  %v588_v19 = vadd.f32 %v568_v5, %v536_v8  ;;  %v589_v21 = vadd.f32 %v569_v9, %v537_v12  ;;  %1344 = vmatpush.msra.mxu3 (%p622_p10), %v1174_v59  ;;  %v1141_v61 = vld [vmem:[%s3235_s3 + $0xf0] sm:$0xff] (%p622_p10)  ;;  %v1123_v1 = vld [vmem:[%s3235_s3 + $0x60] sm:$0xff] (%p622_p10)  ;;  %v1172_v3 = vld [vmem:[%s3235_s3 + $0x1e8] sm:$0xff] (%p622_p10) }
 0x12f   : > { %603 = vst [vmem:[#allocation3 + $0x38] sm:$0xff] %v583_v7  ;;  %v590_v24 = vadd.f32 %v570_v13, %v538_v15  ;;  %v591_v29 = vadd.f32 %v571_v16, %v539_v18  ;;  %v1173_v63 = vld [vmem:[%s3235_s3 + $0x1f0] sm:$0xff] (%p622_p10)  ;;  %1299 = vmatpush.msra.mxu1 (%p622_p10), %v1141_v61  ;;  %v1155_v2 = vld [vmem:[%s3235_s3 + $0x160] sm:$0xff] (%p622_p10)  ;;  %v1122_v6 = vld [vmem:[%s3235_s3 + $0x58] sm:$0xff] (%p622_p10) }
 0x130   : > { %604 = vst [vmem:[#allocation3 + $0x50] sm:$0xff] %v584_v10  ;;  %1345 = vmatpush.msra.mxu3 (%p622_p10), %v1173_v63  ;;  %v1139_v4 = vld [vmem:[%s3235_s3 + $0xe0] sm:$0xff] (%p622_p10)  ;;  %v1154_v7 = vld [vmem:[%s3235_s3 + $0x158] sm:$0xff] (%p622_p10)  ;;  %v1121_v10 = vld [vmem:[%s3235_s3 + $0x50] sm:$0xff] (%p622_p10) }
 0x131   : > { %605 = vst [vmem:[#allocation3 + $0x18] sm:$0xff] %v585_v11  ;;  %v560_v22 = vpop.permute.xlu1 %559  ;;  %v1171_v5 = vld [vmem:[%s3235_s3 + $0x1e0] sm:$0xff] (%p622_p10)  ;;  %v1138_v8 = vld [vmem:[%s3235_s3 + $0xd8] sm:$0xff] (%p622_p10)  ;;  %v1153_v11 = vld [vmem:[%s3235_s3 + $0x150] sm:$0xff] (%p622_p10) }
 0x132   : > { %606 = vst [vmem:[#allocation3 + $0x30] sm:$0xff] %v586_v14  ;;  %v572_v25 = vmul.f32 %v560_v22, %v466_v45  ;;  %v573_v26 = vmul.f32 %v560_v22, %v473_v46  ;;  %v574_v27 = vmul.f32 %v560_v22, %v480_v47  ;;  %v575_v30 = vmul.f32 %v560_v22, %v487_v48  ;;  %v548_v46 = vld [vmem:[#allocation3 + $0x70] sm:$0xff]  ;;  %v1170_v9 = vld [vmem:[%s3235_s3 + $0x1d8] sm:$0xff] (%p622_p10)  ;;  %v1137_v12 = vld [vmem:[%s3235_s3 + $0xd0] sm:$0xff] (%p622_p10) }
 0x133   : > { %607 = vst [vmem:[#allocation3 + $0x68] sm:$0xff] %v587_v17  ;;  %v576_v32 = vmul.f32 %v560_v22, %v494_v49  ;;  %v577_v35 = vmul.f32 %v560_v22, %v501_v50  ;;  %v578_v38 = vmul.f32 %v560_v22, %v508_v52  ;;  %v579_v41 = vmul.f32 %v560_v22, %v515_v54  ;;  %v549_v49 = vld [vmem:[#allocation3 + $0x90] sm:$0xff]  ;;  %v1126_v54 = vld [vmem:[%s3235_s3 + $0x78] sm:$0xff] (%p622_p10)  ;;  %v1169_v13 = vld [vmem:[%s3235_s3 + $0x1d0] sm:$0xff] (%p622_p10) }
 0x134   : > { %608 = vst [vmem:[#allocation3 + $0x78] sm:$0xff] %v588_v19  ;;  %v592_v33 = vadd.f32 %v572_v25, %v540_v20  ;;  %v593_v36 = vadd.f32 %v573_v26, %v541_v23  ;;  %v594_v39 = vadd.f32 %v574_v27, %v542_v28  ;;  %v595_v42 = vadd.f32 %v575_v30, %v543_v31  ;;  %v1120_v14 = vld [vmem:[%s3235_s3 + $0x48] sm:$0xff] (%p622_p10)  ;;  %v1119_v18 = vld [vmem:[%s3235_s3 + $0x40] sm:$0xff] (%p622_p10)  ;;  %v1150_v23 = vld [vmem:[%s3235_s3 + $0x138] sm:$0xff] (%p622_p10) }
 0x135   : > { %609 = vst [vmem:[#allocation3 + $0x80] sm:$0xff] %v589_v21  ;;  %v580_v44 = vmul.f32 %v560_v22, %v2080_v55  ;;  %v596_v45 = vadd.f32 %v576_v32, %v544_v34  ;;  %v581_v47 = vmul.f32 %v560_v22, %v529_v0  ;;  %v597_v48 = vadd.f32 %v577_v35, %v545_v37  ;;  %v1158_v55 = vld [vmem:[%s3235_s3 + $0x178] sm:$0xff] (%p622_p10)  ;;  %v1140_v0 = vld [vmem:[%s3235_s3 + $0xe8] sm:$0xff] (%p622_p10)  ;;  %v1151_v19 = vld [vmem:[%s3235_s3 + $0x140] sm:$0xff] (%p622_p10) }
 0x136   : > { %610 = vst [vmem:[#allocation3 + $0x8] sm:$0xff] %v590_v24  ;;  %v598_v50 = vadd.f32 %v578_v38, %v546_v40  ;;  %v599_v51 = vadd.f32 %v579_v41, %v547_v43  ;;  %1275 = vmatpush.msra.mxu0 (%p622_p10), %v1126_v54  ;;  %1321 = vmatpush.msra.mxu2 (%p622_p10), %v1158_v55  ;;  %v1152_v15 = vld [vmem:[%s3235_s3 + $0x148] sm:$0xff] (%p622_p10)  ;;  %v1135_v20 = vld [vmem:[%s3235_s3 + $0xc0] sm:$0xff] (%p622_p10)  ;;  %v1118_v22 = vld [vmem:[%s3235_s3 + $0x38] sm:$0xff] (%p622_p10) }
 0x137   : > { %611 = vst [vmem:[#allocation3 + $0x88] sm:$0xff] %v591_v29  ;;  %v600_v52 = vadd.f32 %v580_v44, %v548_v46  ;;  %v601_v53 = vadd.f32 %v581_v47, %v549_v49  ;;  %1300 = vmatpush.msra.mxu1 (%p622_p10), %v1140_v0  ;;  %1346 = vmatpush.msra.mxu3 (%p622_p10), %v1172_v3  ;;  %v1136_v16 = vld [vmem:[%s3235_s3 + $0xc8] sm:$0xff] (%p622_p10)  ;;  %v1167_v21 = vld [vmem:[%s3235_s3 + $0x1c0] sm:$0xff] (%p622_p10)  ;;  %v1134_v24 = vld [vmem:[%s3235_s3 + $0xb8] sm:$0xff] (%p622_p10) }
 0x138   : > { %612 = vst [vmem:[#allocation3 + $0x28] sm:$0xff] %v592_v33  ;;  %1276 = vmatpush.msra.mxu0 (%p622_p10), %v1125_v56  ;;  %1322 = vmatpush.msra.mxu2 (%p622_p10), %v1157_v58  ;;  %v1168_v17 = vld [vmem:[%s3235_s3 + $0x1c8] sm:$0xff] (%p622_p10)  ;;  %v1166_v25 = vld [vmem:[%s3235_s3 + $0x1b8] sm:$0xff] (%p622_p10)  ;;  %v1117_v26 = vld [vmem:[%s3235_s3 + $0x30] sm:$0xff] (%p622_p10) }
 0x139   : > { %613 = vst [vmem:[#allocation3 + $0x40] sm:$0xff] %v593_v36  ;;  %1301 = vmatpush.msra.mxu1 (%p622_p10), %v1139_v4  ;;  %1347 = vmatpush.msra.mxu3 (%p622_p10), %v1171_v5  ;;  %v1149_v27 = vld [vmem:[%s3235_s3 + $0x130] sm:$0xff] (%p622_p10)  ;;  %v1116_v30 = vld [vmem:[%s3235_s3 + $0x28] sm:$0xff] (%p622_p10)  ;;  %v1115_v34 = vld [vmem:[%s3235_s3 + $0x20] sm:$0xff] (%p622_p10) }
 0x13a   : > { %614 = vst [vmem:[#allocation3 + $0x58] sm:$0xff] %v594_v39  ;;  %1277 = vmatpush.msra.mxu0 (%p622_p10), %v1124_v60  ;;  %1323 = vmatpush.msra.mxu2 (%p622_p10), %v1156_v62  ;;  %v1133_v28 = vld [vmem:[%s3235_s3 + $0xb0] sm:$0xff] (%p622_p10)  ;;  %v1148_v31 = vld [vmem:[%s3235_s3 + $0x128] sm:$0xff] (%p622_p10)  ;;  %v1147_v35 = vld [vmem:[%s3235_s3 + $0x120] sm:$0xff] (%p622_p10) }
 0x13b   : > { %615 = vst [vmem:[#allocation3 + $0x10] sm:$0xff] %v595_v42  ;;  %1302 = vmatpush.msra.mxu1 (%p622_p10), %v1138_v8  ;;  %1348 = vmatpush.msra.mxu3 (%p622_p10), %v1170_v9  ;;  %v1165_v29 = vld [vmem:[%s3235_s3 + $0x1b0] sm:$0xff] (%p622_p10)  ;;  %v1132_v32 = vld [vmem:[%s3235_s3 + $0xa8] sm:$0xff] (%p622_p10)  ;;  %v1131_v36 = vld [vmem:[%s3235_s3 + $0xa0] sm:$0xff] (%p622_p10) }
 0x13c   : > { %616 = vst [vmem:[#allocation3 + $0x98] sm:$0xff] %v596_v45  ;;  %1278 = vmatpush.msra.mxu0 (%p622_p10), %v1123_v1  ;;  %1324 = vmatpush.msra.mxu2 (%p622_p10), %v1155_v2  ;;  %v1164_v33 = vld [vmem:[%s3235_s3 + $0x1a8] sm:$0xff] (%p622_p10)  ;;  %v1163_v37 = vld [vmem:[%s3235_s3 + $0x1a0] sm:$0xff] (%p622_p10)  ;;  %v1114_v38 = vld [vmem:[%s3235_s3 + $0x18] sm:$0xff] (%p622_p10) }
 0x13d   : > { %617 = vst [vmem:[#allocation3 + $0x60] sm:$0xff] %v597_v48  ;;  %626 = sbr.rel (!%p622_p10) target bundleno = 761 (0x2f9), region = 102  ;;  %1303 = vmatpush.msra.mxu1 (%p622_p10), %v1137_v12  ;;  %1349 = vmatpush.msra.mxu3 (%p622_p10), %v1169_v13  ;;  %v1146_v39 = vld [vmem:[%s3235_s3 + $0x118] sm:$0xff] (%p622_p10)  ;;  %v1113_v42 = vld [vmem:[%s3235_s3 + $0x10] sm:$0xff] (%p622_p10)  ;;  %v1112_v46 = vld [vmem:[%s3235_s3 + $0x8] sm:$0xff] (%p622_p10) }
 0x13e   : > { %618 = vst [vmem:[#allocation3 + $0x20] sm:$0xff] %v598_v50  ;;  %1279 = vmatpush.msra.mxu0 (%p622_p10), %v1122_v6  ;;  %1325 = vmatpush.msra.mxu2 (%p622_p10), %v1154_v7  ;;  %v1130_v40 = vld [vmem:[%s3235_s3 + $0x98] sm:$0xff] (%p622_p10)  ;;  %v1145_v43 = vld [vmem:[%s3235_s3 + $0x110] sm:$0xff] (%p622_p10)  ;;  %v1144_v47 = vld [vmem:[%s3235_s3 + $0x108] sm:$0xff] (%p622_p10) }
 0x13f   : > { %619 = vst [vmem:[#allocation3 + $0x48] sm:$0xff] %v599_v51  ;;  %1304 = vmatpush.msra.mxu1 (%p622_p10), %v1136_v16  ;;  %1350 = vmatpush.msra.mxu3 (%p622_p10), %v1168_v17  ;;  %v1162_v41 = vld [vmem:[%s3235_s3 + $0x198] sm:$0xff] (%p622_p10)  ;;  %v1129_v44 = vld [vmem:[%s3235_s3 + $0x90] sm:$0xff] (%p622_p10)  ;;  %v1128_v48 = vld [vmem:[%s3235_s3 + $0x88] sm:$0xff] (%p622_p10) }
 0x140   : > { %620 = vst [vmem:[#allocation3 + $0x70] sm:$0xff] %v600_v52  ;;  %1280 = vmatpush.msra.mxu0 (%p622_p10), %v1121_v10  ;;  %1326 = vmatpush.msra.mxu2 (%p622_p10), %v1153_v11  ;;  %v1161_v45 = vld [vmem:[%s3235_s3 + $0x190] sm:$0xff] (%p622_p10)  ;;  %v1160_v49 = vld [vmem:[%s3235_s3 + $0x188] sm:$0xff] (%p622_p10)  ;;  %v1111_v50 = vld [vmem:[%s3235_s3] sm:$0xff] (%p622_p10) }
 0x141   : > { %621 = vst [vmem:[#allocation3 + $0x90] sm:$0xff] %v601_v53  ;;  %1305 = vmatpush.msra.mxu1 (%p622_p10), %v1135_v20  ;;  %1351 = vmatpush.msra.mxu3 (%p622_p10), %v1167_v21  ;;  %v1143_v51 = vld [vmem:[%s3235_s3 + $0x100] sm:$0xff] (%p622_p10)  ;;  %v1190_v52 = vld [vmem:[%s3235_s3 + $0x278] sm:$0xff] (%p622_p10)  ;;  %v1189_v56 = vld [vmem:[%s3235_s3 + $0x270] sm:$0xff] (%p622_p10) }
 0x142   : > { %1281 = vmatpush.msra.mxu0 %v1120_v14  ;;  %1327 = vmatpush.msra.mxu2 %v1152_v15  ;;  %v1222_v53 = vld [vmem:[%s3235_s3 + $0x378] sm:$0xff]  ;;  %v1127_v54 = vld [vmem:[%s3235_s3 + $0x80] sm:$0xff]  ;;  %v1221_v58 = vld [vmem:[%s3235_s3 + $0x370] sm:$0xff] }
 0x143   : > { %1306 = vmatpush.msra.mxu1 %v1134_v24  ;;  %1352 = vmatpush.msra.mxu3 %v1166_v25  ;;  %v1159_v55 = vld [vmem:[%s3235_s3 + $0x180] sm:$0xff]  ;;  %v1206_v57 = vld [vmem:[%s3235_s3 + $0x2f8] sm:$0xff]  ;;  %v1188_v60 = vld [vmem:[%s3235_s3 + $0x268] sm:$0xff] }
 0x144   : > { %1282 = vmatpush.msra.mxu0 %v1119_v18  ;;  %1328 = vmatpush.msra.mxu2 %v1151_v19  ;;  %v1238_v59 = vld [vmem:[%s3235_s3 + $0x3f8] sm:$0xff]  ;;  %v1205_v61 = vld [vmem:[%s3235_s3 + $0x2f0] sm:$0xff]  ;;  %v1220_v62 = vld [vmem:[%s3235_s3 + $0x368] sm:$0xff] }
 0x145   : > { %1307 = vmatpush.msra.mxu1 %v1133_v28  ;;  %1353 = vmatpush.msra.mxu3 %v1165_v29  ;;  %v1237_v63 = vld [vmem:[%s3235_s3 + $0x3f0] sm:$0xff]  ;;  %v1187_v0 = vld [vmem:[%s3235_s3 + $0x260] sm:$0xff]  ;;  %v1204_v1 = vld [vmem:[%s3235_s3 + $0x2e8] sm:$0xff] }
 0x146   : > { %1283 = vmatpush.msra.mxu0 %v1118_v22  ;;  %1329 = vmatpush.msra.mxu2 %v1150_v23  ;;  %v1219_v2 = vld [vmem:[%s3235_s3 + $0x360] sm:$0xff]  ;;  %v1236_v3 = vld [vmem:[%s3235_s3 + $0x3e8] sm:$0xff]  ;;  %v627_v6 = vld [vmem:[#allocation3] sm:$0xff] }
 0x147   : > { %1308 = vmatpush.msra.mxu1 %v1132_v32  ;;  %1354 = vmatpush.msra.mxu3 %v1164_v33  ;;  %v629_v4 = vld [vmem:[#allocation3 + $0x50] sm:$0xff]  ;;  %v2323_v5 = vld [vmem:[%s3234_s2] sm:$0xff]  ;;  %v1186_v7 = vld [vmem:[%s3235_s3 + $0x258] sm:$0xff]  ;;  %v647_v10 = vmul.f32 0.00390625, %v627_v6 }
 0x148   : > { %1284 = vmatpush.msra.mxu0 %v1117_v26  ;;  %1330 = vmatpush.msra.mxu2 %v1149_v27  ;;  %v649_v8 = vmul.f32 0.00390625, %v629_v4  ;;  %v673_v9 = vperm.slane %v2323_v5, 2  ;;  %v671_v11 = vperm.slane %v2323_v5, 0  ;;  %v630_v12 = vld [vmem:[#allocation3 + $0x18] sm:$0xff]  ;;  %v1203_v14 = vld [vmem:[%s3235_s3 + $0x2e0] sm:$0xff]  ;;  %v1218_v15 = vld [vmem:[%s3235_s3 + $0x358] sm:$0xff] }
 0x149   : > { %1309 = vmatpush.msra.mxu1 %v1131_v36  ;;  %1355 = vmatpush.msra.mxu3 %v1163_v37  ;;  %v628_v13 = vld [vmem:[#allocation3 + $0x38] sm:$0xff]  ;;  %v1235_v16 = vld [vmem:[%s3235_s3 + $0x3e0] sm:$0xff]  ;;  %v650_v17 = vmul.f32 0.00390625, %v630_v12  ;;  %v674_v18 = vperm.slane %v2323_v5, 3  ;;  %v672_v23 = vperm.slane %v2323_v5, 1  ;;  %v640_v29 = vld [vmem:[#allocation3 + $0x10] sm:$0xff] }
 0x14a   : > { %1285 = vmatpush.msra.mxu0 %v1116_v30  ;;  %1331 = vmatpush.msra.mxu2 %v1148_v31  ;;  %v648_v19 = vmul.f32 0.00390625, %v628_v13  ;;  %v1185_v20 = vld [vmem:[%s3235_s3 + $0x250] sm:$0xff]  ;;  %v2343_v21 = vadd.f32 %v673_v9, %v649_v8  ;;  %v2345_v22 = vadd.f32 %v671_v11, %v647_v10  ;;  %v637_v25 = vld [vmem:[#allocation3 + $0x28] sm:$0xff]  ;;  %v638_v30 = vld [vmem:[#allocation3 + $0x40] sm:$0xff]  ;;  %v677_v32 = vperm.slane %v2323_v5, 6 }
 0x14b   : > { %1310 = vmatpush.msra.mxu1 %v1130_v40  ;;  %1356 = vmatpush.msra.mxu3 %v1162_v41  ;;  %v639_v24 = vld [vmem:[#allocation3 + $0x58] sm:$0xff]  ;;  %v2348_v26 = vadd.f32 %v674_v18, %v650_v17  ;;  %v657_v28 = vmul.f32 0.00390625, %v637_v25  ;;  %v1202_v33 = vld [vmem:[%s3235_s3 + $0x2d8] sm:$0xff]  ;;  %v660_v37 = vmul.f32 0.00390625, %v640_v29  ;;  %v675_v6 = vperm.slane %v2323_v5, 4  ;;  %v1212_v25 = vld [vmem:[%s3235_s3 + $0x328] sm:$0xff] }
 0x14c   : > { %1286 = vmatpush.msra.mxu0 %v1115_v34  ;;  %1332 = vmatpush.msra.mxu2 %v1147_v35  ;;  %v659_v27 = vmul.f32 0.00390625, %v639_v24  ;;  %v633_v31 = vld [vmem:[#allocation3 + $0x78] sm:$0xff]  ;;  %v1699_v34 = vmul.f32 -1.442695, %v2343_v21  ;;  %v1697_v35 = vmul.f32 -1.442695, %v2345_v22  ;;  %v2356_v36 = vadd.f32 %v672_v23, %v648_v19 }
 0x14d   : > { %1311 = vmatpush.msra.mxu1 %v1129_v44  ;;  %1357 = vmatpush.msra.mxu3 %v1161_v45  ;;  %v1700_v40 = vmul.f32 -1.442695, %v2348_v26  ;;  %v1184_v44 = vld [vmem:[%s3235_s3 + $0x248] sm:$0xff]  ;;  %v1201_v45 = vld [vmem:[%s3235_s3 + $0x2d0] sm:$0xff]  ;;  %v1198_v8 = vld [vmem:[%s3235_s3 + $0x2b8] sm:$0xff] }
 0x14e   : > { %1287 = vmatpush.msra.mxu0 %v1114_v38  ;;  %1333 = vmatpush.msra.mxu2 %v1146_v39  ;;  %v1217_v38 = vld [vmem:[%s3235_s3 + $0x350] sm:$0xff]  ;;  %v1234_v39 = vld [vmem:[%s3235_s3 + $0x3d8] sm:$0xff]  ;;  %v2365_v41 = vadd.f32 %v673_v9, %v659_v27  ;;  %1805 = vpow2.f32 %v1699_v34  ;;  %v1211_v34 = vld [vmem:[%s3235_s3 + $0x320] sm:$0xff] }
 0x14f   : > { %1312 = vmatpush.msra.mxu1 %v1128_v48  ;;  %1358 = vmatpush.msra.mxu3 %v1160_v49  ;;  %v653_v48 = vmul.f32 0.00390625, %v633_v31  ;;  %v1216_v49 = vld [vmem:[%s3235_s3 + $0x348] sm:$0xff]  ;;  %1807 = vpow2.f32 %v1697_v35  ;;  %v1213_v10 = vld [vmem:[%s3235_s3 + $0x330] sm:$0xff] }
 0x150   : > { %1288 = vmatpush.msra.mxu0 %v1113_v42  ;;  %1334 = vmatpush.msra.mxu2 %v1145_v43  ;;  %v2367_v42 = vadd.f32 %v671_v11, %v657_v28  ;;  %v658_v43 = vmul.f32 0.00390625, %v638_v30  ;;  %1809 = vpow2.f32 %v1700_v40  ;;  %v1230_v11 = vld [vmem:[%s3235_s3 + $0x3b8] sm:$0xff]  ;;  %v1197_v17 = vld [vmem:[%s3235_s3 + $0x2b0] sm:$0xff]  ;;  %v1179_v28 = vld [vmem:[%s3235_s3 + $0x220] sm:$0xff] }
 0x151   : > { %1313 = vmatpush.msra.mxu1 %v1127_v54  ;;  %1359 = vmatpush.msra.mxu3 %v1159_v55  ;;  %v1200_v54 = vld [vmem:[%s3235_s3 + $0x2c8] sm:$0xff]  ;;  %v1229_v27 = vld [vmem:[%s3235_s3 + $0x3b0] sm:$0xff] }
 0x152   : > { %1289 = vmatpush.msra.mxu0 %v1112_v46  ;;  %1335 = vmatpush.msra.mxu2 %v1144_v47  ;;  %v1698_v46 = vmul.f32 -1.442695, %v2356_v36  ;;  %v2376_v47 = vadd.f32 %v674_v18, %v660_v37  ;;  %v1707_v55 = vmul.f32 -1.442695, %v2367_v42  ;;  %v676_v37 = vperm.slane %v2323_v5, 5 }
 0x153   : > { %1390 = vmatpush.msrb.mxu1 %v1206_v57  ;;  %1436 = vmatpush.msrb.mxu3 %v1238_v59  ;;  %v1215_v57 = vld [vmem:[%s3235_s3 + $0x340] sm:$0xff] }
 0x154   : > { %1290 = vmatpush.msra.mxu0 %v1111_v50  ;;  %1336 = vmatpush.msra.mxu2 %v1143_v51  ;;  %v1233_v50 = vld [vmem:[%s3235_s3 + $0x3d0] sm:$0xff]  ;;  %v1709_v51 = vmul.f32 -1.442695, %v2365_v41  ;;  %1811 = vpow2.f32 %v1698_v46  ;;  %v1710_v59 = vmul.f32 -1.442695, %v2376_v47  ;;  %v1178_v46 = vld [vmem:[%s3235_s3 + $0x218] sm:$0xff] }
 0x155   : > { %1391 = vmatpush.msrb.mxu1 %v1205_v61  ;;  %1437 = vmatpush.msrb.mxu3 %v1237_v63  ;;  %v1199_v61 = vld [vmem:[%s3235_s3 + $0x2c0] sm:$0xff]  ;;  %v2410_v63 = vadd.f32 %v677_v32, %v653_v48 }
 0x156   : > { %1367 = vmatpush.msrb.mxu0 %v1190_v52  ;;  %1413 = vmatpush.msrb.mxu2 %v1222_v53  ;;  %v2385_v52 = vadd.f32 %v672_v23, %v658_v43  ;;  %v1183_v53 = vld [vmem:[%s3235_s3 + $0x240] sm:$0xff]  ;;  %1813 = vpow2.f32 %v1709_v51 }
 0x157   : > { %1392 = vmatpush.msrb.mxu1 %v1204_v1  ;;  %1438 = vmatpush.msrb.mxu3 %v1236_v3  ;;  %v1214_v1 = vld [vmem:[%s3235_s3 + $0x338] sm:$0xff]  ;;  %v1181_v3 = vld [vmem:[%s3235_s3 + $0x230] sm:$0xff]  ;;  %1815 = vpow2.f32 %v1707_v55  ;;  %v1703_v19 = vmul.f32 -1.442695, %v2410_v63  ;;  %v1195_v48 = vld [vmem:[%s3235_s3 + $0x2a0] sm:$0xff] }
 0x158   : > { %1368 = vmatpush.msrb.mxu0 %v1189_v56  ;;  %1414 = vmatpush.msrb.mxu2 %v1221_v58  ;;  %v631_v56 = vld [vmem:[#allocation3 + $0x30] sm:$0xff]  ;;  %1817 = vpow2.f32 %v1710_v59  ;;  %v1210_v55 = vld [vmem:[%s3235_s3 + $0x318] sm:$0xff] }
 0x159   : > { %1393 = vmatpush.msrb.mxu1 %v1203_v14  ;;  %1439 = vmatpush.msrb.mxu3 %v1235_v16  ;;  %v1232_v58 = vld [vmem:[%s3235_s3 + $0x3c8] sm:$0xff]  ;;  %v651_v4 = vmul.f32 0.00390625, %v631_v56  ;;  %v632_v14 = vld [vmem:[#allocation3 + $0x68] sm:$0xff] }
 0x15a   : > { %1369 = vmatpush.msrb.mxu0 %v1188_v60  ;;  %1415 = vmatpush.msrb.mxu2 %v1220_v62  ;;  %v1182_v60 = vld [vmem:[%s3235_s3 + $0x238] sm:$0xff]  ;;  %v1708_v62 = vmul.f32 -1.442695, %v2385_v52  ;;  %v1180_v16 = vld [vmem:[%s3235_s3 + $0x228] sm:$0xff]  ;;  %v2466_v35 = vmul.f32 0.00390625, %v632_v14  ;;  %v1227_v56 = vld [vmem:[%s3235_s3 + $0x3a0] sm:$0xff] }
 0x15b   : > { %1394 = vmatpush.msrb.mxu1 %v1202_v33  ;;  %1440 = vmatpush.msrb.mxu3 %v1234_v39  ;;  %v2456_v29 = vadd.f32 %v675_v6, %v651_v4  ;;  %v1196_v33 = vld [vmem:[%s3235_s3 + $0x2a8] sm:$0xff]  ;;  %v1193_v14 = vld [vmem:[%s3235_s3 + $0x290] sm:$0xff] }
 0x15c   : > { %1370 = vmatpush.msrb.mxu0 %v1187_v0  ;;  %1416 = vmatpush.msrb.mxu2 %v1219_v2  ;;  %v634_v0 = vld [vmem:[#allocation3 + $0x80] sm:$0xff]  ;;  %v1231_v2 = vld [vmem:[%s3235_s3 + $0x3c0] sm:$0xff]  ;;  %1819 = vpow2.f32 %v1708_v62 }
 0x15d   : > { %1395 = vmatpush.msrb.mxu1 %v1201_v45  ;;  %1441 = vmatpush.msrb.mxu3 %v1233_v50  ;;  %v654_v13 = vmul.f32 0.00390625, %v634_v0  ;;  %v1194_v62 = vld [vmem:[%s3235_s3 + $0x298] sm:$0xff] }
 0x15e   : > { %1371 = vmatpush.msrb.mxu0 %v1186_v7  ;;  %1417 = vmatpush.msrb.mxu2 %v1218_v15  ;;  %v1806_v7 = vpop.eup %1805 }
 0x15f   : > { %1396 = vmatpush.msrb.mxu1 %v1200_v54  ;;  %1442 = vmatpush.msrb.mxu3 %v1232_v58  ;;  %v1808_v9 = vpop.eup %1807  ;;  %v2431_v12 = vadd.f32 1.0, %v1806_v7  ;;  %v1209_v7 = vld [vmem:[%s3235_s3 + $0x310] sm:$0xff] }
 0x160   : > { %1372 = vmatpush.msrb.mxu0 %v1185_v20  ;;  %1418 = vmatpush.msrb.mxu2 %v1217_v38  ;;  %v1810_v15 = vpop.eup %1809  ;;  %v2439_v18 = vadd.f32 1.0, %v1808_v9  ;;  %v678_v20 = vperm.slane %v2323_v5, 7 }
 0x161   : > { %1397 = vmatpush.msrb.mxu1 %v1199_v61  ;;  %1443 = vmatpush.msrb.mxu3 %v1231_v2  ;;  %v1812_v23 = vpop.eup %1811  ;;  %1821 = vrcp.f32 %v2431_v12  ;;  %v832_v24 = vand.u32 2147483648, %v2431_v12  ;;  %v830_v31 = vand.u32 2147483647, %v2431_v12  ;;  %v2471_v43 = vadd.f32 1.0, %v1810_v15  ;;  %v1177_v61 = vld [vmem:[%s3235_s3 + $0x210] sm:$0xff] }
 0x162   : > { %1373 = vmatpush.msrb.mxu0 %v1184_v44  ;;  %1419 = vmatpush.msrb.mxu2 %v1216_v49  ;;  %v1814_v30 = vpop.eup %1813  ;;  %1823 = vrcp.f32 %v2439_v18  ;;  %v800_v39 = vand.u32 2147483647, %v2439_v18  ;;  %v802_v40 = vand.u32 2147483648, %v2439_v18  ;;  %v1228_v44 = vld [vmem:[%s3235_s3 + $0x3a8] sm:$0xff]  ;;  %v2476_v45 = vadd.f32 1.0, %v1812_v23  ;;  %v1225_v23 = vld [vmem:[%s3235_s3 + $0x390] sm:$0xff] }
 0x163   : > { %1398 = vmatpush.msrb.mxu1 %v1198_v8  ;;  %1444 = vmatpush.msrb.mxu3 %v1230_v11  ;;  %v1816_v38 = vpop.eup %1815  ;;  %vm826_vm3 = vweird.f32 %v2431_v12  ;;  %v2485_v49 = vadd.f32 1.0, %v1814_v30  ;;  %1825 = vpow2.f32 %v1703_v19  ;;  %v2489_v50 = vadd.f32 %v678_v20, %v654_v13  ;;  %v1226_v8 = vld [vmem:[%s3235_s3 + $0x398] sm:$0xff]  ;;  %v1176_v13 = vld [vmem:[%s3235_s3 + $0x208] sm:$0xff]  ;;  %v1175_v30 = vld [vmem:[%s3235_s3 + $0x200] sm:$0xff] }
 0x164   : > { %1374 = vmatpush.msrb.mxu0 %v1183_v53  ;;  %1420 = vmatpush.msrb.mxu2 %v1215_v57  ;;  %v2491_v51 = vpop.eup %1817  ;;  %v2493_v53 = vor.u32 1.1754944e-38, %v832_v24  ;;  %vm796_vm4 = vweird.f32 %v2439_v18  ;;  %1827 = vrcp.f32 %v2471_v43  ;;  %v847_v54 = vand.u32 2147483648, %v2471_v43  ;;  %v1208_v19 = vld [vmem:[%s3235_s3 + $0x308] sm:$0xff] }
 0x165   : > { %1399 = vmatpush.msrb.mxu1 %v1197_v17  ;;  %1445 = vmatpush.msrb.mxu3 %v1229_v27  ;;  %v2504_v57 = vpop.eup %1819  ;;  %vm2506_vm5 = vcmp.eq.f32.partialorder %v830_v31, 8.507059e+37  ;;  %v845_v59 = vand.u32 2147483647, %v2471_v43  ;;  %1829 = vrcp.f32 %v2476_v45  ;;  %v2519_v0 = vadd.f32 1.0, %v1816_v38  ;;  %v1192_v31 = vld [vmem:[%s3235_s3 + $0x288] sm:$0xff] }
 0x166   : > { %1375 = vmatpush.msrb.mxu0 %v1182_v60  ;;  %1421 = vmatpush.msrb.mxu2 %v1214_v1  ;;  %v817_v60 = vand.u32 2147483648, %v2476_v45  ;;  %vm2523_vm6 = vcmp.eq.f32.partialorder %v800_v39, 8.507059e+37  ;;  %v815_v4 = vand.u32 2147483647, %v2476_v45  ;;  %1831 = vrcp.f32 %v2485_v49 }
 0x167   : > { %1400 = vmatpush.msrb.mxu1 %v1196_v33  ;;  %1446 = vmatpush.msrb.mxu3 %v1228_v44  ;;  %v2521_v1 = vpop.eup %1821  ;;  %vm841_vm7 = vweird.f32 %v2471_v43  ;;  %v2542_v11 = vor.u32 1.1754944e-38, %v847_v54  ;;  %vm811_vm8 = vweird.f32 %v2476_v45  ;;  %vm976_vm9 = vweird.f32 %v2485_v49  ;;  %v1207_v44 = vld [vmem:[%s3235_s3 + $0x300] sm:$0xff] }
 0x168   : > { %1376 = vmatpush.msrb.mxu0 %v1181_v3  ;;  %1422 = vmatpush.msrb.mxu2 %v1213_v10  ;;  %v2527_v3 = vor.u32 1.1754944e-38, %v802_v40  ;;  %v2537_v9 = vpop.eup %1823  ;;  %v822_v10 = vmul.f32 %v2521_v1, %v2431_v12  ;;  %v982_v17 = vand.u32 2147483648, %v2485_v49  ;;  %vm827_vm10 = vweird.f32 %v2521_v1 }
 0x169   : > { %1401 = vmatpush.msrb.mxu1 %v1195_v48  ;;  %1447 = vmatpush.msrb.mxu3 %v1227_v56  ;;  %v792_v15 = vmul.f32 %v2537_v9, %v2439_v18  ;;  %v2562_v24 = vpop.eup %1825  ;;  %vm2565_vm11 = vcmp.eq.f32.partialorder %v845_v59, 8.507059e+37  ;;  %1833 = vrcp.f32 %v2519_v0  ;;  %vm797_vm12 = vweird.f32 %v2537_v9  ;;  %v1191_v59 = vld [vmem:[%s3235_s3 + $0x280] sm:$0xff]  ;;  %vm2612_vm1 = vmor %vm826_vm3, %vm827_vm10 }
 0x16a   : > { %1377 = vmatpush.msrb.mxu0 %v1180_v16  ;;  %1423 = vmatpush.msrb.mxu2 %v1212_v25  ;;  %v980_v16 = vand.u32 2147483647, %v2485_v49  ;;  %v823_v25 = vsub.f32 1.0, %v822_v10  ;;  %v2578_v33 = vpop.eup %1827  ;;  %vm2581_vm13 = vcmp.eq.f32.partialorder %v815_v4, 8.507059e+37  ;;  %v950_v39 = vand.u32 2147483647, %v2519_v0  ;;  %vm2628_vm3 = vmor %vm796_vm4, %vm797_vm12 }
 0x16b   : > { %1402 = vmatpush.msrb.mxu1 %v1194_v62  ;;  %1448 = vmatpush.msrb.mxu3 %v1226_v8  ;;  %v952_v40 = vand.u32 2147483648, %v2519_v0  ;;  %v2593_v48 = vpop.eup %1829  ;;  %vm842_vm2 = vweird.f32 %v2578_v33  ;;  %v1223_v8 = vld [vmem:[%s3235_s3 + $0x380] sm:$0xff]  ;;  %v1701_v56 = vmul.f32 -1.442695, %v2456_v29 }
 0x16c   : > { %1378 = vmatpush.msrb.mxu0 %v1179_v28  ;;  %1424 = vmatpush.msrb.mxu2 %v1211_v34  ;;  %v2569_v28 = vor.u32 1.1754944e-38, %v817_v60  ;;  %v793_v34 = vsub.f32 1.0, %v792_v15  ;;  %v824_v54 = vmul.f32 %v2521_v1, %v823_v25  ;;  %vm2598_vm14 = vcmp.eq.f32.partialorder %v980_v16, 8.507059e+37  ;;  %v2606_v60 = vpop.eup %1831  ;;  %vm2660_vm4 = vmor %vm841_vm7, %vm842_vm2 }
 0x16d   : > { %1403 = vmatpush.msrb.mxu1 %v1193_v14  ;;  %1449 = vmatpush.msrb.mxu3 %v1225_v23  ;;  %v807_v4 = vmul.f32 %v2593_v48, %v2476_v45  ;;  %vm812_vm10 = vweird.f32 %v2593_v48  ;;  %v972_v14 = vmul.f32 %v2606_v60, %v2485_v49  ;;  %vm977_vm0 = vweird.f32 %v2606_v60  ;;  %v1253_v49 = vld [vmem:[%s3235_s3 + $0x470] sm:$0xff] }
 0x16e   : > { %1379 = vmatpush.msrb.mxu0 %v1178_v46  ;;  %1425 = vmatpush.msrb.mxu2 %v1210_v55  ;;  %v1224_v46 = vld [vmem:[%s3235_s3 + $0x388] sm:$0xff]  ;;  %v837_v55 = vmul.f32 %v2578_v33, %v2471_v43  ;;  %v794_v62 = vmul.f32 %v2537_v9, %v793_v34  ;;  %v825_v12 = vadd.f32 %v2521_v1, %v824_v54  ;;  %vm2637_vm15 = vcmp.eq.f32.partialorder %v950_v39, 8.507059e+37 }
 0x16f   : > { %1404 = vmatpush.msrb.mxu1 %v1192_v31  ;;  %1450 = vmatpush.msrb.mxu3 %v1224_v46  ;;  %v808_v16 = vsub.f32 1.0, %v807_v4  ;;  %v2641_v18 = vor.u32 1.1754944e-38, %v952_v40  ;;  %v2648_v31 = vadd.f32 1.0, %v2491_v51 }
 0x170   : > { %1380 = vmatpush.msrb.mxu0 %v1177_v61  ;;  %1426 = vmatpush.msrb.mxu2 %v1209_v7  ;;  %v983_v7 = vor.u32 1.1754944e-38, %v982_v17  ;;  %v795_v15 = vadd.f32 %v2537_v9, %v794_v62  ;;  %v829_v23 = vsel %vm2612_vm1, %v2521_v1, %v825_v12  ;;  %v2711_v62 = vadd.f32 1.0, %v2562_v24  ;;  %v1267_v1 = vld [vmem:[%s3235_s3 + $0x4e0] sm:$0xff] }
 0x171   : > { %1405 = vmatpush.msrb.mxu1 %v1191_v59  ;;  %1451 = vmatpush.msrb.mxu3 %v1223_v8  ;;  %v834_v34 = vsel %vm2506_vm5, %v2493_v53, %v829_v23  ;;  %v809_v51 = vmul.f32 %v2593_v48, %v808_v16  ;;  %vm2675_vm5 = vmor %vm811_vm8, %vm812_vm10  ;;  %1835 = vrcp.f32 %v2648_v31  ;;  %v995_v24 = vand.u32 2147483647, %v2648_v31  ;;  %v1268_v23 = vld [vmem:[%s3235_s3 + $0x4e8] sm:$0xff] }
 0x172   : > { %1381 = vmatpush.msrb.mxu0 %v1176_v13  ;;  %1427 = vmatpush.msrb.mxu2 %v1208_v19  ;;  %v838_v13 = vsub.f32 1.0, %v837_v55  ;;  %v1834_v19 = vpop.eup %1833  ;;  %v799_v39 = vsel %vm2628_vm3, %v2537_v9, %v795_v15  ;;  %v1704_v12 = vmul.f32 -1.442695, %v2489_v50  ;;  %v1251_v15 = vld [vmem:[%s3235_s3 + $0x460] sm:$0xff]  ;;  %v892_v43 = vand.u32 2147483648, %v2711_v62 }
 0x173   : > { %v942_v40 = vmul.f32 %v1834_v19, %v2519_v0  ;;  %v804_v53 = vsel %vm2523_vm6, %v2527_v3, %v799_v39  ;;  %v810_v2 = vadd.f32 %v2593_v48, %v809_v51  ;;  %vm2689_vm6 = vmor %vm976_vm9, %vm977_vm0  ;;  %vm947_vm7 = vweird.f32 %v1834_v19 }
 0x174   : > { %1382 = vmatpush.msrb.mxu0 %v1175_v30  ;;  %1428 = vmatpush.msrb.mxu2 %v1207_v44  ;;  %v839_v25 = vmul.f32 %v2578_v33, %v838_v13  ;;  %v973_v30 = vsub.f32 1.0, %v972_v14  ;;  %v1093_v44 = vmul.f32 %v834_v34, %v2343_v21  ;;  %v1254_v21 = vld [vmem:[%s3235_s3 + $0x478] sm:$0xff]  ;;  %v1091_v46 = vmul.f32 %v804_v53, %v2345_v22  ;;  %v644_v34 = vld [vmem:[#allocation3 + $0x48] sm:$0xff] }
 0x175   : > { %v943_v3 = vsub.f32 1.0, %v942_v40  ;;  %v2699_v22 = vadd.f32 1.0, %v2504_v57  ;;  %vm3265_vm0 = vweird.f32 %v2519_v0  ;;  %v1252_v0 = vld [vmem:[%s3235_s3 + $0x468] sm:$0xff]  ;;  %vm991_vm9 = vweird.f32 %v2648_v31 }
 0x176   : > { %v840_v58 = vadd.f32 %v2578_v33, %v839_v25  ;;  %v974_v9 = vmul.f32 %v2606_v60, %v973_v30  ;;  %1337 = vmatmul.f32.vlgmr.msra.gmra.mxu2 %v1093_v44  ;;  %1291 = vmatmul.f32.vlgmr.msra.gmra.mxu0 %v1091_v46  ;;  %vm2723_vm8 = vmor %vm3265_vm0, %vm947_vm7  ;;  %v641_v25 = vld [vmem:[#allocation3 + $0x98] sm:$0xff]  ;;  %v1250_v30 = vld [vmem:[%s3235_s3 + $0x458] sm:$0xff] }
 0x177   : > { %v944_v61 = vmul.f32 %v1834_v19, %v943_v3  ;;  %1726 = vmatpush.msra.mxu2 %v1254_v21  ;;  %1459 = vmatpush.msra.mxu0 %v1254_v21  ;;  %1837 = vrcp.f32 %v2699_v22  ;;  %v2753_v10 = vpop.eup %1835  ;;  %v642_v44 = vld [vmem:[#allocation3 + $0x60] sm:$0xff]  ;;  %v1249_v3 = vld [vmem:[%s3235_s3 + $0x450] sm:$0xff] }
 0x178   : > { %v844_v54 = vsel %vm2660_vm4, %v2578_v33, %v840_v58  ;;  %v975_v55 = vadd.f32 %v2606_v60, %v974_v9  ;;  %v814_v33 = vsel %vm2675_vm5, %v2593_v48, %v810_v2  ;;  %1839 = vrcp.f32 %v2711_v62 }
 0x179   : > { %v849_v59 = vsel %vm2565_vm11, %v2542_v11, %v844_v54  ;;  %v819_v4 = vsel %vm2581_vm13, %v2569_v28, %v814_v33  ;;  %v945_v48 = vadd.f32 %v1834_v19, %v944_v61  ;;  %1727 = vmatpush.msra.mxu2 %v1253_v49  ;;  %1460 = vmatpush.msra.mxu0 %v1253_v49  ;;  %vm2759_vm11 = vcmp.eq.f32.partialorder %v995_v24, 8.507059e+37  ;;  %v1266_v54 = vld [vmem:[%s3235_s3 + $0x4d8] sm:$0xff]  ;;  %v1248_v61 = vld [vmem:[%s3235_s3 + $0x448] sm:$0xff]  ;;  %v1265_v11 = vld [vmem:[%s3235_s3 + $0x4d0] sm:$0xff] }
 0x17a   : > { %v1094_v57 = vmul.f32 %v849_v59, %v2348_v26  ;;  %v979_v27 = vsel %vm2689_vm6, %v2606_v60, %v975_v55  ;;  %v1270_v26 = vld [vmem:[%s3235_s3 + $0x4f8] sm:$0xff]  ;;  %v1092_v28 = vmul.f32 %v819_v4, %v2356_v36  ;;  %v997_v60 = vand.u32 2147483648, %v2648_v31  ;;  %v1269_v36 = vld [vmem:[%s3235_s3 + $0x4f0] sm:$0xff]  ;;  %v645_v49 = vld [vmem:[#allocation3 + $0x70] sm:$0xff] }
 0x17b   : > { %v984_v38 = vsel %vm2598_vm14, %v983_v7, %v979_v27  ;;  %v949_v7 = vsel %vm2723_vm8, %v1834_v19, %v945_v48  ;;  %1461 = vmatpush.msra.mxu0 %v1252_v0  ;;  %v987_v19 = vmul.f32 %v2753_v10, %v2648_v31  ;;  %1728 = vmatpush.msra.mxu2 %v1252_v0  ;;  %vm992_vm12 = vweird.f32 %v2753_v10 }
 0x17c   : > { %1360 = vmatmul.f32.vlgmr.msra.gmra.mxu3 %v1094_v57  ;;  %v1103_v8 = vmul.f32 %v984_v38, %v2365_v41  ;;  %1314 = vmatmul.f32.vlgmr.msra.gmra.mxu1 %v1092_v28  ;;  %v2751_v41 = vadd.f32 %v676_v37, %v2466_v35  ;;  %v954_v13 = vsel %vm2637_vm15, %v2641_v18, %v949_v7  ;;  %v643_v35 = vld [vmem:[#allocation3 + $0x20] sm:$0xff]  ;;  %v2769_v17 = vor.u32 1.1754944e-38, %v997_v60  ;;  %vm2809_vm1 = vmor %vm991_vm9, %vm992_vm12  ;;  %v1247_v28 = vld [vmem:[%s3235_s3 + $0x440] sm:$0xff] }
 0x17d   : > { %1742 = vmatpush.msra.mxu3 %v1270_v26  ;;  %1482 = vmatpush.msra.mxu1 %v1270_v26  ;;  %v1101_v16 = vmul.f32 %v954_v13, %v2367_v42  ;;  %v965_v18 = vand.u32 2147483647, %v2699_v22  ;;  %vm961_vm13 = vweird.f32 %v2699_v22  ;;  %v967_v42 = vand.u32 2147483648, %v2699_v22  ;;  %v2785_v53 = vpop.eup %1837 }
 0x17e   : > { %1340 = vmatmul.f32.gmra.mxu2 %v1103_v8  ;;  %1841 = vpow2.f32 %v1701_v56  ;;  %v988_v39 = vsub.f32 1.0, %v987_v19  ;;  %v1702_v51 = vmul.f32 -1.442695, %v2751_v41  ;;  %v663_v40 = vmul.f32 0.00390625, %v643_v35  ;;  %1462 = vmatpush.msra.mxu0 %v1251_v15  ;;  %v2790_v21 = vpop.eup %1839  ;;  %v2877_v35 = vld [vmem:[%s3234_s2 + $0x8] sm:$0x3] }
 0x17f   : > { %1743 = vmatpush.msra.mxu3 %v1269_v36  ;;  %1483 = vmatpush.msra.mxu1 %v1269_v36  ;;  %1843 = vpow2.f32 %v1704_v12  ;;  %vm886_vm14 = vweird.f32 %v2711_v62  ;;  %v890_v58 = vand.u32 2147483647, %v2711_v62  ;;  %v661_v9 = vmul.f32 0.00390625, %v641_v25  ;;  %v1264_v36 = vld [vmem:[%s3235_s3 + $0x4c8] sm:$0xff] }
 0x180   : > { %1294 = vmatmul.f32.gmra.mxu0 %v1101_v16  ;;  %1729 = vmatpush.msra.mxu2 %v1251_v15  ;;  %v989_v46 = vmul.f32 %v2753_v10, %v988_v39  ;;  %v957_v2 = vmul.f32 %v2785_v53, %v2699_v22  ;;  %vm2795_vm15 = vcmp.eq.f32.partialorder %v965_v18, 8.507059e+37  ;;  %v664_v55 = vmul.f32 0.00390625, %v644_v34 }
 0x181   : > { %1484 = vmatpush.msra.mxu1 %v1268_v23  ;;  %1744 = vmatpush.msra.mxu3 %v1268_v23  ;;  %v968_v59 = vor.u32 1.1754944e-38, %v967_v42  ;;  %v882_v33 = vmul.f32 %v2790_v21, %v2711_v62  ;;  %v2820_v57 = vadd.f32 %v677_v32, %v663_v40  ;;  %v662_v4 = vmul.f32 0.00390625, %v642_v44 }
 0x182   : > { %1730 = vmatpush.msra.mxu2 %v1250_v30  ;;  %1463 = vmatpush.msra.mxu0 %v1250_v30  ;;  %v990_v31 = vadd.f32 %v2753_v10, %v989_v46  ;;  %v958_v27 = vsub.f32 1.0, %v957_v2  ;;  %vm962_vm2 = vweird.f32 %v2785_v53  ;;  %1845 = vpow2.f32 %v1702_v51 }
 0x183   : > { %1485 = vmatpush.msra.mxu1 %v1267_v1  ;;  %1745 = vmatpush.msra.mxu3 %v1267_v1  ;;  %v883_v26 = vsub.f32 1.0, %v882_v33  ;;  %vm887_vm3 = vweird.f32 %v2790_v21  ;;  %v1713_v32 = vmul.f32 -1.442695, %v2820_v57  ;;  %v2834_v38 = vadd.f32 %v675_v6, %v661_v9  ;;  %vm2856_vm10 = vmor %vm961_vm13, %vm962_vm2  ;;  %v1246_v9 = vld [vmem:[%s3235_s3 + $0x438] sm:$0xff] }
 0x184   : > { %1731 = vmatpush.msra.mxu2 %v1249_v3  ;;  %v1842_v24 = vpop.eup %1841  ;;  %1464 = vmatpush.msra.mxu0 %v1249_v3  ;;  %v994_v60 = vsel %vm2809_vm1, %v2753_v10, %v990_v31  ;;  %v959_v0 = vmul.f32 %v2785_v53, %v958_v27  ;;  %v2847_v56 = vadd.f32 %v678_v20, %v664_v55  ;;  %v635_v20 = vld [vmem:[#allocation3 + $0x8] sm:$0xff]  ;;  %vm2869_vm4 = vmor %vm886_vm14, %vm887_vm3  ;;  %v893_v15 = vor.u32 1.1754944e-38, %v892_v43 }
 0x185   : > { %1486 = vmatpush.msra.mxu1 %v1266_v54  ;;  %v1844_v48 = vpop.eup %1843  ;;  %v2840_v8 = vadd.f32 1.0, %v1842_v24  ;;  %1746 = vmatpush.msra.mxu3 %v1266_v54  ;;  %v999_v6 = vsel %vm2759_vm11, %v2769_v17, %v994_v60  ;;  %v884_v12 = vmul.f32 %v2790_v21, %v883_v26  ;;  %1847 = vpow2.f32 %v1713_v32  ;;  %v1244_v24 = vld [vmem:[%s3235_s3 + $0x428] sm:$0xff]  ;;  %v1261_v26 = vld [vmem:[%s3235_s3 + $0x4b0] sm:$0xff] }
 0x186   : > { %1732 = vmatpush.msra.mxu2 %v1248_v61  ;;  %v2861_v10 = vadd.f32 1.0, %v1844_v48  ;;  %1465 = vmatpush.msra.mxu0 %v1248_v61  ;;  %v1104_v13 = vmul.f32 %v999_v6, %v2376_v47  ;;  %v960_v14 = vadd.f32 %v2785_v53, %v959_v0  ;;  %vm2880_vm5 = vcmp.eq.f32.partialorder %v890_v58, 8.507059e+37  ;;  %v1245_v61 = vld [vmem:[%s3235_s3 + $0x430] sm:$0xff]  ;;  %v1243_v48 = vld [vmem:[%s3235_s3 + $0x420] sm:$0xff] }
 0x187   : > { %1487 = vmatpush.msra.mxu1 %v1265_v11  ;;  %1849 = vrcp.f32 %v2840_v8  ;;  %1747 = vmatpush.msra.mxu3 %v1265_v11  ;;  %v885_v47 = vadd.f32 %v2790_v21, %v884_v12  ;;  %v1711_v62 = vmul.f32 -1.442695, %v2834_v38  ;;  %v1714_v18 = vmul.f32 -1.442695, %v2847_v56 }
 0x188   : > { %1733 = vmatpush.msra.mxu2 %v1247_v28  ;;  %1851 = vrcp.f32 %v2861_v10  ;;  %1466 = vmatpush.msra.mxu0 %v1247_v28  ;;  %v1846_v19 = vpop.eup %1845  ;;  %v964_v17 = vsel %vm2856_vm10, %v2785_v53, %v960_v14  ;;  %v655_v23 = vmul.f32 0.00390625, %v635_v20  ;;  %v2897_v30 = vadd.f32 %v676_v37, %v662_v4  ;;  %v1262_v4 = vld [vmem:[%s3235_s3 + $0x4b8] sm:$0xff] }
 0x189   : > { %1488 = vmatpush.msra.mxu1 %v1264_v36  ;;  %1363 = vmatmul.f32.gmra.mxu3 %v1104_v13  ;;  %v969_v25 = vsel %vm2795_vm15, %v968_v59, %v964_v17  ;;  %v889_v42 = vsel %vm2869_vm4, %v2790_v21, %v885_v47  ;;  %v679_v34 = vperm.slane %v2877_v35, 0  ;;  %v860_v51 = vand.u32 2147483647, %v2840_v8  ;;  %v1260_v13 = vld [vmem:[%s3235_s3 + $0x4a8] sm:$0xff]  ;;  %v1242_v47 = vld [vmem:[%s3235_s3 + $0x418] sm:$0xff] }
 0x18a   : > { %1748 = vmatpush.msra.mxu3 %v1264_v36  ;;  %v1102_v39 = vmul.f32 %v969_v25, %v2385_v52  ;;  %v894_v1 = vsel %vm2880_vm5, %v893_v15, %v889_v42  ;;  %v862_v40 = vand.u32 2147483648, %v2840_v8  ;;  %v905_v58 = vand.u32 2147483647, %v2861_v10  ;;  %1467 = vmatpush.msra.mxu0 %v1246_v9  ;;  %v1241_v42 = vld [vmem:[%s3235_s3 + $0x410] sm:$0xff] }
 0x18b   : > { %v1848_v44 = vpop.eup %1847  ;;  %v1097_v53 = vmul.f32 %v894_v1, %v2410_v63  ;;  %v2907_v43 = vadd.f32 1.0, %v1846_v19  ;;  %1853 = vpow2.f32 %v1711_v62  ;;  %vm856_vm6 = vweird.f32 %v2840_v8  ;;  %v1263_v63 = vld [vmem:[%s3235_s3 + $0x4c0] sm:$0xff]  ;;  %1734 = vmatpush.msra.mxu2 %v1246_v9 }
 0x18c   : > { %1317 = vmatmul.f32.gmra.mxu1 %v1102_v39  ;;  %v907_v52 = vand.u32 2147483648, %v2861_v10  ;;  %v2913_v37 = vadd.f32 1.0, %v1848_v44  ;;  %1855 = vpow2.f32 %v1714_v18  ;;  %v1712_v2 = vmul.f32 -1.442695, %v2897_v30  ;;  %1749 = vmatpush.msra.mxu3 %v1263_v63  ;;  %v1259_v19 = vld [vmem:[%s3235_s3 + $0x4a0] sm:$0xff]  ;;  %v1258_v44 = vld [vmem:[%s3235_s3 + $0x498] sm:$0xff] }
 0x18d   : > { %v2909_v5 = vpop.eup %1849  ;;  %1429 = vmatmul.f32.vlgmr.msrb.gmra.mxu2 %v1097_v53  ;;  %1857 = vrcp.f32 %v2907_v43  ;;  %v2929_v45 = vadd.f32 %v679_v34, %v655_v23  ;;  %vm2931_vm7 = vcmp.eq.f32.partialorder %v860_v51, 8.507059e+37  ;;  %v2935_v54 = vor.u32 1.1754944e-38, %v862_v40  ;;  %1489 = vmatpush.msra.mxu1 %v1263_v63  ;;  %v1240_v63 = vld [vmem:[%s3235_s3 + $0x408] sm:$0xff] }
 0x18e   : > { %v2921_v21 = vpop.eup %1851  ;;  %v852_v46 = vmul.f32 %v2909_v5, %v2840_v8  ;;  %vm901_vm0 = vweird.f32 %v2861_v10  ;;  %vm857_vm8 = vweird.f32 %v2909_v5  ;;  %vm2941_vm9 = vcmp.eq.f32.partialorder %v905_v58, 8.507059e+37  ;;  %1468 = vmatpush.msra.mxu0 %v1245_v61  ;;  %1735 = vmatpush.msra.mxu2 %v1245_v61 }
 0x18f   : > { %v897_v55 = vmul.f32 %v2921_v21, %v2861_v10  ;;  %1859 = vrcp.f32 %v2913_v37  ;;  %vm902_vm11 = vweird.f32 %v2921_v21  ;;  %v908_v27 = vor.u32 1.1754944e-38, %v907_v52  ;;  %1490 = vmatpush.msra.mxu1 %v1262_v4  ;;  %1750 = vmatpush.msra.mxu3 %v1262_v4  ;;  %vm2971_vm12 = vmor %vm856_vm6, %vm857_vm8 }
 0x190   : > { %v853_v59 = vsub.f32 1.0, %v852_v46  ;;  %v875_v11 = vand.u32 2147483647, %v2907_v43  ;;  %1861 = vpow2.f32 %v1712_v2  ;;  %v1705_v60 = vmul.f32 -1.442695, %v2929_v45  ;;  %1469 = vmatpush.msra.mxu0 %v1244_v24  ;;  %1736 = vmatpush.msra.mxu2 %v1244_v24  ;;  %vm2990_vm14 = vmor %vm901_vm0, %vm902_vm11 }
 0x191   : > { %v898_v31 = vsub.f32 1.0, %v897_v55  ;;  %v1854_v32 = vpop.eup %1853  ;;  %v2965_v0 = vmul.f32 0.00390625, %v645_v49  ;;  %vm871_vm13 = vweird.f32 %v2907_v43  ;;  %v877_v12 = vand.u32 2147483648, %v2907_v43  ;;  %1491 = vmatpush.msra.mxu1 %v1261_v26  ;;  %1751 = vmatpush.msra.mxu3 %v1261_v26  ;;  %v1257_v49 = vld [vmem:[%s3235_s3 + $0x490] sm:$0xff] }
 0x192   : > { %v854_v28 = vmul.f32 %v2909_v5, %v853_v59  ;;  %v1856_v36 = vpop.eup %1855  ;;  %v2978_v20 = vadd.f32 1.0, %v1854_v32  ;;  %vm1036_vm15 = vweird.f32 %v2913_v37  ;;  %v1040_v15 = vand.u32 2147483647, %v2913_v37  ;;  %1470 = vmatpush.msra.mxu0 %v1243_v48  ;;  %1737 = vmatpush.msra.mxu2 %v1243_v48  ;;  %v1239_v59 = vld [vmem:[%s3235_s3 + $0x400] sm:$0xff]  ;;  %v1256_v32 = vld [vmem:[%s3235_s3 + $0x488] sm:$0xff] }
 0x193   : > { %v899_v7 = vmul.f32 %v2921_v21, %v898_v31  ;;  %v2983_v14 = vpop.eup %1857  ;;  %1863 = vpow2.f32 %v1705_v60  ;;  %vm3002_vm1 = vcmp.eq.f32.partialorder %v875_v11, 8.507059e+37  ;;  %v1042_v23 = vand.u32 2147483648, %v2913_v37  ;;  %1492 = vmatpush.msra.mxu1 %v1260_v13  ;;  %1752 = vmatpush.msra.mxu3 %v1260_v13 }
 0x194   : > { %v855_v8 = vadd.f32 %v2909_v5, %v854_v28  ;;  %v867_v10 = vmul.f32 %v2983_v14, %v2907_v43  ;;  %1865 = vrcp.f32 %v2978_v20  ;;  %vm872_vm2 = vweird.f32 %v2983_v14  ;;  %1471 = vmatpush.msra.mxu0 %v1242_v47  ;;  %1738 = vmatpush.msra.mxu2 %v1242_v47 }
 0x195   : > { %v900_v16 = vadd.f32 %v2921_v21, %v899_v7  ;;  %v3010_v17 = vpop.eup %1859  ;;  %v3017_v25 = vadd.f32 1.0, %v1856_v36  ;;  %v878_v52 = vor.u32 1.1754944e-38, %v877_v12  ;;  %vm3036_vm3 = vcmp.eq.f32.partialorder %v1040_v15, 8.507059e+37  ;;  %1493 = vmatpush.msra.mxu1 %v1259_v19  ;;  %1753 = vmatpush.msra.mxu3 %v1259_v19  ;;  %vm3050_vm4 = vmor %vm871_vm13, %vm872_vm2  ;;  %v1255_v19 = vld [vmem:[%s3235_s3 + $0x480] sm:$0xff] }
 0x196   : > { %v859_v18 = vsel %vm2971_vm12, %v2909_v5, %v855_v8  ;;  %v868_v51 = vsub.f32 1.0, %v867_v10  ;;  %v1032_v40 = vmul.f32 %v3010_v17, %v2913_v37  ;;  %v1862_v53 = vpop.eup %1861  ;;  %vm1037_vm10 = vweird.f32 %v3010_v17  ;;  %1472 = vmatpush.msra.mxu0 %v1241_v42  ;;  %1739 = vmatpush.msra.mxu2 %v1241_v42 }
 0x197   : > { %v864_v39 = vsel %vm2931_vm7, %v2935_v54, %v859_v18  ;;  %v904_v1 = vsel %vm2990_vm14, %v2921_v21, %v900_v16  ;;  %v1043_v55 = vor.u32 1.1754944e-38, %v1042_v23  ;;  %1867 = vrcp.f32 %v3017_v25  ;;  %1494 = vmatpush.msra.mxu1 %v1258_v44  ;;  %vm3079_vm5 = vmor %vm1036_vm15, %vm1037_vm10  ;;  %1754 = vmatpush.msra.mxu3 %v1258_v44 }
 0x198   : > { %v1095_v58 = vmul.f32 %v864_v39, %v2456_v29  ;;  %v909_v5 = vsel %vm2941_vm9, %v908_v27, %v904_v1  ;;  %v869_v46 = vmul.f32 %v2983_v14, %v868_v51  ;;  %v1033_v2 = vsub.f32 1.0, %v1032_v40  ;;  %v636_v29 = vld [vmem:[#allocation3 + $0x88] sm:$0xff]  ;;  %1473 = vmatpush.msra.mxu0 %v1240_v63  ;;  %1740 = vmatpush.msra.mxu2 %v1240_v63 }
 0x199   : > { %v1098_v21 = vmul.f32 %v909_v5, %v2489_v50  ;;  %v1864_v3 = vpop.eup %1863  ;;  %v1010_v50 = vand.u32 2147483647, %v2978_v20  ;;  %v3065_v43 = vadd.f32 %v679_v34, %v2965_v0  ;;  %v3071_v31 = vadd.f32 1.0, %v1862_v53  ;;  %1495 = vmatpush.msra.mxu1 %v1257_v49  ;;  %1755 = vmatpush.msra.mxu3 %v1257_v49 }
 0x19a   : > { %1383 = vmatmul.f32.vlgmr.msrb.gmra.mxu0 %v1095_v58  ;;  %v3067_v33 = vpop.eup %1865  ;;  %v870_v61 = vadd.f32 %v2983_v14, %v869_v46  ;;  %v1034_v4 = vmul.f32 %v3010_v17, %v1033_v2  ;;  %v3073_v27 = vadd.f32 1.0, %v1864_v3  ;;  %v1012_v24 = vand.u32 2147483648, %v2978_v20  ;;  %1741 = vmatpush.msra.mxu2 %v1239_v59 }
 0x19b   : > { %1452 = vmatmul.f32.vlgmr.msrb.gmra.mxu3 %v1098_v21  ;;  %v1002_v34 = vmul.f32 %v3067_v33, %v2978_v20  ;;  %v1055_v26 = vand.u32 2147483647, %v3017_v25  ;;  %v656_v28 = vmul.f32 0.00390625, %v636_v29  ;;  %v1057_v60 = vand.u32 2147483648, %v3017_v25  ;;  %1474 = vmatpush.msra.mxu0 %v1239_v59 }
 0x19c   : > { %v874_v37 = vsel %vm3050_vm4, %v2983_v14, %v870_v61  ;;  %v1035_v48 = vadd.f32 %v3010_v17, %v1034_v4  ;;  %1869 = vrcp.f32 %v3071_v31  ;;  %vm1006_vm6 = vweird.f32 %v2978_v20  ;;  %1496 = vmatpush.msra.mxu1 %v1256_v32  ;;  %1756 = vmatpush.msra.mxu3 %v1256_v32 }
 0x19d   : > { %v879_v0 = vsel %vm3002_vm1, %v878_v52, %v874_v37  ;;  %v1003_v36 = vsub.f32 1.0, %v1002_v34  ;;  %vm1007_vm7 = vweird.f32 %v3067_v33  ;;  %vm3104_vm0 = vcmp.eq.f32.partialorder %v1010_v50, 8.507059e+37  ;;  %v1868_v13 = vpop.eup %1867 }
 0x19e   : > { %v1096_v6 = vmul.f32 %v879_v0, %v2751_v41  ;;  %v1039_v7 = vsel %vm3079_vm5, %v3010_v17, %v1035_v48  ;;  %1871 = vrcp.f32 %v3073_v27  ;;  %v1013_v22 = vor.u32 1.1754944e-38, %v1012_v24  ;;  %v646_v41 = vld [vmem:[#allocation3 + $0x90] sm:$0xff]  ;;  %vm3118_vm9 = vmor %vm1006_vm6, %vm1007_vm7  ;;  %1497 = vmatpush.msra.mxu1 %v1255_v19  ;;  %1757 = vmatpush.msra.mxu3 %v1255_v19 }
 0x19f   : > { %v1044_v14 = vsel %vm3036_vm3, %v1043_v55, %v1039_v7  ;;  %v1004_v8 = vmul.f32 %v3067_v33, %v1003_v36  ;;  %vm1051_vm8 = vweird.f32 %v3017_v25  ;;  %v1047_v16 = vmul.f32 %v1868_v13, %v3017_v25 }
 0x1a0   : > { %1406 = vmatmul.f32.vlgmr.msrb.gmra.mxu1 %v1096_v6  ;;  %v1107_v15 = vmul.f32 %v1044_v14, %v2820_v57  ;;  %vm3123_vm11 = vcmp.eq.f32.partialorder %v1055_v26, 8.507059e+37  ;;  %v1058_v62 = vor.u32 1.1754944e-38, %v1057_v60  ;;  %vm1021_vm12 = vweird.f32 %v3071_v31 }
 0x1a1   : > { %v1005_v57 = vadd.f32 %v3067_v33, %v1004_v8  ;;  %v1715_v20 = vmul.f32 -1.442695, %v3065_v43  ;;  %v680_v17 = vperm.slane %v2877_v35, 1  ;;  %v1048_v23 = vsub.f32 1.0, %v1047_v16 }
 0x1a2   : > { %v1870_v18 = vpop.eup %1869  ;;  %1432 = vmatmul.f32.gmra.mxu2 %v1107_v15  ;;  %vm1052_vm13 = vweird.f32 %v1868_v13  ;;  %v1025_v42 = vand.u32 2147483647, %v3071_v31  ;;  %v666_v39 = vmul.f32 0.00390625, %v646_v41  ;;  %v1027_v40 = vand.u32 2147483648, %v3071_v31 }
 0x1a3   : > { %v1009_v1 = vsel %vm3118_vm9, %v3067_v33, %v1005_v57  ;;  %v1017_v51 = vmul.f32 %v1870_v18, %v3071_v31  ;;  %vm916_vm14 = vweird.f32 %v3073_v27  ;;  %v1049_v53 = vmul.f32 %v1868_v13, %v1048_v23  ;;  %vm3148_vm15 = vmor %vm1051_vm8, %vm1052_vm13 }
 0x1a4   : > { %v1872_v44 = vpop.eup %1871  ;;  %v1014_v35 = vsel %vm3104_vm0, %v1013_v22, %v1009_v1  ;;  %1873 = vpow2.f32 %v1715_v20  ;;  %v3143_v58 = vadd.f32 %v680_v17, %v656_v28  ;;  %vm1022_vm1 = vweird.f32 %v1870_v18 }
 0x1a5   : > { %v1105_v5 = vmul.f32 %v1014_v35, %v2834_v38  ;;  %v1018_v9 = vsub.f32 1.0, %v1017_v51  ;;  %v912_v63 = vmul.f32 %v1872_v44, %v3073_v27  ;;  %v1050_v21 = vadd.f32 %v1868_v13, %v1049_v53  ;;  %vm3162_vm3 = vmor %vm1021_vm12, %vm1022_vm1 }
 0x1a6   : > { %v922_v46 = vand.u32 2147483648, %v3073_v27  ;;  %v1706_v2 = vmul.f32 -1.442695, %v3143_v58  ;;  %v3155_v29 = vadd.f32 %v680_v17, %v666_v39  ;;  %vm917_vm2 = vweird.f32 %v1872_v44 }
 0x1a7   : > { %1386 = vmatmul.f32.gmra.mxu0 %v1105_v5  ;;  %v1019_v3 = vmul.f32 %v1870_v18, %v1018_v9  ;;  %v913_v38 = vsub.f32 1.0, %v912_v63  ;;  %v920_v25 = vand.u32 2147483647, %v3073_v27  ;;  %v1054_v54 = vsel %vm3148_vm15, %v1868_v13, %v1050_v21  ;;  %vm918_vm4 = vmor %vm916_vm14, %vm917_vm2 }
 0x1a8   : > { %v1028_v50 = vor.u32 1.1754944e-38, %v1027_v40  ;;  %1875 = vpow2.f32 %v1706_v2  ;;  %v1716_v49 = vmul.f32 -1.442695, %v3155_v29  ;;  %v1059_v59 = vsel %vm3123_vm11, %v1058_v62, %v1054_v54  ;;  %v1803_v2 = vld [vmem:[%s3236_s4] ss:$0 sm:$0xff] }
 0x1a9   : > { %v1020_v33 = vadd.f32 %v1870_v18, %v1019_v3  ;;  %vm1026_vm10 = vcmp.eq.f32.partialorder %v1025_v42, 8.507059e+37  ;;  %v914_v61 = vmul.f32 %v1872_v44, %v913_v38  ;;  %v1108_v11 = vmul.f32 %v1059_v59, %v2847_v56 }
 0x1aa   : > { %v1874_v4 = vpop.eup %1873  ;;  %v923_v31 = vor.u32 1.1754944e-38, %v922_v46  ;;  %1877 = vpow2.f32 %v1716_v49  ;;  %vm921_vm5 = vcmp.eq.f32.partialorder %v920_v25, 8.507059e+37 }
 0x1ab   : > { %v1024_v34 = vsel %vm3162_vm3, %v1870_v18, %v1020_v33  ;;  %v915_v24 = vadd.f32 %v1872_v44, %v914_v61  ;;  %v789_v26 = vadd.f32 1.0, %v1874_v4  ;;  %1455 = vmatmul.f32.gmra.mxu3 %v1108_v11 }
 0x1ac   : > { %v1029_v32 = vsel %vm1026_vm10, %v1028_v50, %v1024_v34 }
 0x1ad   : > { %v1106_v28 = vmul.f32 %v1029_v32, %v2897_v30  ;;  %v919_v37 = vsel %vm918_vm4, %v1872_v44, %v915_v24  ;;  %1879 = vrcp.f32 %v789_v26  ;;  %v1070_v12 = vand.u32 2147483647, %v789_v26 }
 0x1ae   : > { %v1876_v48 = vpop.eup %1875  ;;  %v924_v60 = vsel %vm921_vm5, %v923_v31, %v919_v37  ;;  %v1072_v13 = vand.u32 2147483648, %v789_v26  ;;  %vm1066_vm6 = vweird.f32 %v789_v26 }
 0x1af   : > { %1409 = vmatmul.f32.gmra.mxu1 %v1106_v28  ;;  %v1099_v56 = vmul.f32 %v924_v60, %v2929_v45  ;;  %v780_v27 = vadd.f32 1.0, %v1876_v48  ;;  %vm1071_vm8 = vcmp.eq.f32.partialorder %v1070_v12, 8.507059e+37 }
 0x1b0   : > { %v1878_v0 = vpop.eup %1877  ;;  %v1073_v45 = vor.u32 1.1754944e-38, %v1072_v13 }
 0x1b1   : > { %1475 = vmatmul.f32.vlgmr.msra.gmra.mxu0 %v1099_v56  ;;  %1881 = vrcp.f32 %v780_v27  ;;  %v790_v36 = vadd.f32 1.0, %v1878_v0  ;;  %v937_v8 = vand.u32 2147483648, %v780_v27  ;;  %vm931_vm9 = vweird.f32 %v780_v27 }
 0x1b2   : > { %v935_v62 = vand.u32 2147483647, %v780_v27 }
 0x1b3   : > { %v1880_v6 = vpop.eup %1879  ;;  %1883 = vrcp.f32 %v790_v36  ;;  %v938_v19 = vor.u32 1.1754944e-38, %v937_v8  ;;  %vm1081_vm12 = vweird.f32 %v790_v36  ;;  %v1087_v18 = vand.u32 2147483648, %v790_v36 }
 0x1b4   : > { %v1062_v7 = vmul.f32 %v1880_v6, %v789_v26  ;;  %vm1067_vm7 = vweird.f32 %v1880_v6  ;;  %v1085_v39 = vand.u32 2147483647, %v790_v36  ;;  %vm936_vm15 = vcmp.eq.f32.partialorder %v935_v62, 8.507059e+37 }
 0x1b5   : > { %vm3176_vm0 = vmor %vm1066_vm6, %vm1067_vm7  ;;  %v1088_v35 = vor.u32 1.1754944e-38, %v1087_v18 }
 0x1b6   : > { %v1063_v14 = vsub.f32 1.0, %v1062_v7  ;;  %vm1086_vm2 = vcmp.eq.f32.partialorder %v1085_v39, 8.507059e+37 }
 0x1b7   : > { %v1882_v30 = vpop.eup %1881 }
 0x1b8   : > { %v1064_v22 = vmul.f32 %v1880_v6, %v1063_v14  ;;  %v927_v41 = vmul.f32 %v1882_v30, %v780_v27  ;;  %vm932_vm11 = vweird.f32 %v1882_v30 }
 0x1b9   : > { %v1884_v47 = vpop.eup %1883  ;;  %vm933_vm13 = vmor %vm931_vm9, %vm932_vm11  ;;  %vm1599_vm9 = vcmask 261120   ;;  %vm3308_vm11 = vcmask 7168  }
 0x1ba   : > { %v1065_v16 = vadd.f32 %v1880_v6, %v1064_v22  ;;  %v928_v10 = vsub.f32 1.0, %v927_v41  ;;  %v1077_v57 = vmul.f32 %v1884_v47, %v790_v36  ;;  %vm1082_vm14 = vweird.f32 %v1884_v47 }
 0x1bb   : > { %vm1083_vm1 = vmor %vm1081_vm12, %vm1082_vm14 }
 0x1bc   : > { %v1069_v20 = vsel %vm3176_vm0, %v1880_v6, %v1065_v16  ;;  %v929_v17 = vmul.f32 %v1882_v30, %v928_v10  ;;  %v1078_v42 = vsub.f32 1.0, %v1077_v57  ;;  %vm3309_vm12 = vmmov %vm3308_vm11 }
 0x1bd   : > { %v1074_v23 = vsel %vm1071_vm8, %v1073_v45, %v1069_v20 }
 0x1be   : > { %v1109_v1 = vmul.f32 %v1074_v23, %v3065_v43  ;;  %v930_v51 = vadd.f32 %v1882_v30, %v929_v17  ;;  %v1079_v40 = vmul.f32 %v1884_v47, %v1078_v42 }
 0x1c0   : > { %1478 = vmatmul.f32.vlgmr.msra.gmra.mxu2 %v1109_v1  ;;  %v934_v44 = vsel %vm933_vm13, %v1882_v30, %v930_v51  ;;  %v1080_v5 = vadd.f32 %v1884_v47, %v1079_v40 }
 0x1c1   : > { %v939_v53 = vsel %vm936_vm15, %v938_v19, %v934_v44 }
 0x1c2   : > { %v1100_v52 = vmul.f32 %v939_v53, %v3143_v58  ;;  %v1084_v9 = vsel %vm1083_vm1, %v1884_v47, %v1080_v5 }
 0x1c3   : > { %v1089_v63 = vsel %vm1086_vm2, %v1088_v35, %v1084_v9 }
 0x1c4   : > { %1498 = vmatmul.f32.vlgmr.msra.gmra.mxu1 %v1100_v52  ;;  %v1110_v21 = vmul.f32 %v1089_v63, %v3155_v29 }
 0x1c6   : > { %1501 = vmatmul.f32.vlgmr.msra.gmra.mxu3 %v1110_v21 }
 0x1f3   : > { %v1292_v46 = vpop.f32.mrf.mxu0 }
 0x1f4   : > { %v1293_v25 = vadd.f32 %v1803_v2, %v1292_v46 }
 0x1f9   : > { %v1315_v43 = vpop.f32.mrf.mxu1  ;;  %v1338_v3 = vpop.f32.mrf.mxu2 }
 0x1fa   : > { %v1316_v54 = vadd.f32 %v1315_v43, %v1293_v25 }
 0x1fc   : > { %v1339_v49 = vadd.f32 %v1338_v3, %v1316_v54 }
 0x1fd   : > { %v1295_v38 = vpop.f32.mrf.mxu0 }
 0x1fe   : > { %v1296_v59 = vadd.f32 %v1803_v2, %v1295_v38 }
 0x1ff   : > { %v1361_v55 = vpop.f32.mrf.mxu3 }
 0x200   : > { %v1362_v61 = vadd.f32 %v1361_v55, %v1339_v49 }
 0x201   : > { %v1341_v58 = vpop.f32.mrf.mxu2 }
 0x209   : > { %v1318_v50 = vpop.f32.mrf.mxu1 }
 0x20a   : > { %v1319_v4 = vadd.f32 %v1318_v50, %v1296_v59 }
 0x20c   : > { %v1364_v29 = vpop.f32.mrf.mxu3  ;;  %v1342_v34 = vadd.f32 %v1341_v58, %v1319_v4 }
 0x20e   : > { %v1365_v28 = vadd.f32 %v1364_v29, %v1342_v34 }
 0x210   : > { %v1430_v24 = vpop.f32.mrf.mxu2 }
 0x217   : > { %v1384_v33 = vpop.f32.mrf.mxu0 }
 0x218   : > { %v1385_v31 = vadd.f32 %v1384_v33, %v1362_v61 }
 0x21d   : > { %v1407_v11 = vpop.f32.mrf.mxu1 }
 0x21e   : > { %v1408_v32 = vadd.f32 %v1407_v11, %v1385_v31  ;;  %v1453_v48 = vpop.f32.mrf.mxu3 }
 0x220   : > { %v1431_v37 = vadd.f32 %v1430_v24, %v1408_v32 }
 0x222   : > { %v1454_v0 = vadd.f32 %v1453_v48, %v1431_v37 }
 0x224   : > { %v1387_v26 = vpop.f32.mrf.mxu0 }
 0x225   : > { %v1388_v60 = vadd.f32 %v1387_v26, %v1365_v28  ;;  %v1433_v36 = vpop.f32.mrf.mxu2 }
 0x22c   : > { %v1410_v56 = vpop.f32.mrf.mxu1 }
 0x22d   : > { %v1411_v6 = vadd.f32 %v1410_v56, %v1388_v60 }
 0x22e   : > { %v1476_v27 = vpop.f32.mrf.mxu0  ;;  %v1456_v14 = vpop.f32.mrf.mxu3 }
 0x22f   : > { %v1477_v7 = vadd.f32 %v1476_v27, %v1454_v0  ;;  %v1434_v12 = vadd.f32 %v1433_v36, %v1411_v6 }
 0x231   : > { %v1457_v41 = vadd.f32 %v1456_v14, %v1434_v12 }
 0x241   : > { %v1499_v13 = vpop.f32.mrf.mxu1 }
 0x242   : > { %v3188_v30 = vadd.f32 %v1499_v13, %v1477_v7 }
 0x243   : > { %v1479_v22 = vpop.f32.mrf.mxu2 }
 0x244   : > { %v3191_v8 = vmul.f32 0.70710677, %v3188_v30  ;;  %v1480_v45 = vadd.f32 %v1479_v22, %v1457_v41 }
 0x246   : > { %v1509_v15 = vmul.f32 %v3191_v8, %v3191_v8 }
 0x248   : > { %v1510_v47 = vmin.f32 %v1509_v15, 16.0 }
 0x249   : > { %v1502_v62 = vpop.f32.mrf.mxu3 }
 0x24a   : > { %v1511_v16 = vmul.f32 2.1237322e-06, %v1510_v47  ;;  %v1522_v10 = vmul.f32 3.8918573e-05, %v1510_v47  ;;  %v3195_v19 = vadd.f32 %v1502_v62, %v1480_v45  ;;  %v1505_v62 = vmul.f32 0.5, %v3188_v30 }
 0x24c   : > { %v1512_v57 = vadd.f32 0.00028619796, %v1511_v16  ;;  %v1523_v20 = vadd.f32 0.001143296, %v1522_v10  ;;  %v3198_v17 = vmul.f32 0.70710677, %v3195_v19 }
 0x24e   : > { %v1513_v18 = vmul.f32 %v1512_v57, %v1510_v47  ;;  %v1524_v23 = vmul.f32 %v1523_v20, %v1510_v47  ;;  %v1549_v42 = vmul.f32 %v3198_v17, %v3198_v17 }
 0x250   : > { %v1525_v39 = vadd.f32 0.014752088, %v1524_v23  ;;  %v1514_v1 = vadd.f32 0.0036580483, %v1513_v18  ;;  %v1550_v51 = vmin.f32 %v1549_v42, 16.0 }
 0x252   : > { %v1526_v40 = vmul.f32 %v1525_v39, %v1510_v47  ;;  %v1551_v44 = vmul.f32 2.1237322e-06, %v1550_v51  ;;  %v1562_v35 = vmul.f32 3.8918573e-05, %v1550_v51  ;;  %v1515_v5 = vmul.f32 %v1514_v1, %v1510_v47 }
 0x254   : > { %v1527_v53 = vadd.f32 0.112945676, %v1526_v40  ;;  %v1552_v52 = vadd.f32 0.00028619796, %v1551_v44  ;;  %v1563_v9 = vadd.f32 0.001143296, %v1562_v35 }
 0x255   : > { %v1516_v2 = vadd.f32 0.05243302, %v1515_v5  ;;  %v1506_v35 = vmul.f32 0.5, %v3195_v19 }
 0x256   : > { %v1528_v63 = vmul.f32 %v1527_v53, %v1510_v47  ;;  %v1553_v21 = vmul.f32 %v1552_v52, %v1550_v51  ;;  %v1564_v46 = vmul.f32 %v1563_v9, %v1550_v51 }
 0x257   : > { %v1517_v50 = vmul.f32 %v1516_v2, %v1510_v47 }
 0x258   : > { %v1529_v43 = vadd.f32 0.4994258, %v1528_v63  ;;  %v1565_v3 = vadd.f32 0.014752088, %v1564_v46  ;;  %v1554_v25 = vadd.f32 0.0036580483, %v1553_v21  ;;  %v1607_v63 = vstv %s1606_s18 }
 0x259   : > { %v1518_v33 = vadd.f32 0.18741608, %v1517_v50 }
 0x25a   : > { %v1530_v38 = vmul.f32 %v1529_v43, %v1510_v47  ;;  %v1566_v54 = vmul.f32 %v1565_v3, %v1550_v51  ;;  %v1555_v58 = vmul.f32 %v1554_v25, %v1550_v51 }
 0x25b   : > { %v1519_v31 = vmul.f32 %v1518_v33, %v1510_v47 }
 0x25c   : > { %v1531_v55 = vadd.f32 1.0, %v1530_v38  ;;  %v1567_v49 = vadd.f32 0.112945676, %v1566_v54  ;;  %v1556_v4 = vadd.f32 0.05243302, %v1555_v58 }
 0x25d   : > { %v1520_v37 = vadd.f32 1.1283791, %v1519_v31 }
 0x25e   : > { %1885 = vrcp.f32 %v1531_v55  ;;  %v1568_v59 = vmul.f32 %v1567_v49, %v1550_v51  ;;  %v1557_v26 = vmul.f32 %v1556_v4, %v1550_v51  ;;  %v1543_v28 = vand.u32 2147483648, %v1531_v55 }
 0x25f   : > { %v1541_v60 = vand.u32 2147483647, %v1531_v55  ;;  %vm1537_vm10 = vweird.f32 %v1531_v55  ;;  %v1521_v6 = vmul.f32 %v1520_v37, %v3191_v8  ;;  %v1804_v8 = vld [vmem:[%s3237_s5] ss:$0 sm:$0xff] }
 0x260   : > { %v1569_v61 = vadd.f32 0.4994258, %v1568_v59  ;;  %v1558_v56 = vadd.f32 0.18741608, %v1557_v26  ;;  %v1544_v0 = vor.u32 1.1754944e-38, %v1543_v28 }
 0x261   : > { %vm1542_vm5 = vcmp.eq.f32.partialorder %v1541_v60, 8.507059e+37 }
 0x262   : > { %v1570_v29 = vmul.f32 %v1569_v61, %v1550_v51  ;;  %v1559_v13 = vmul.f32 %v1558_v56, %v1550_v51 }
 0x264   : > { %v1886_v11 = vpop.eup %1885  ;;  %v1571_v24 = vadd.f32 1.0, %v1570_v29  ;;  %v1560_v47 = vadd.f32 1.1283791, %v1559_v13 }
 0x265   : > { %v1533_v34 = vmul.f32 %v1886_v11, %v1531_v55  ;;  %vm1538_vm3 = vweird.f32 %v1886_v11 }
 0x266   : > { %1887 = vrcp.f32 %v1571_v24  ;;  %vm1539_vm4 = vmor %vm1537_vm10, %vm1538_vm3  ;;  %v1583_v15 = vand.u32 2147483648, %v1571_v24  ;;  %v1581_v10 = vand.u32 2147483647, %v1571_v24  ;;  %vm1577_vm7 = vweird.f32 %v1571_v24 }
 0x267   : > { %v1534_v32 = vsub.f32 1.0, %v1533_v34  ;;  %v1561_v42 = vmul.f32 %v1560_v47, %v3198_v17 }
 0x268   : > { %v1584_v18 = vor.u32 1.1754944e-38, %v1583_v15  ;;  %vm1582_vm8 = vcmp.eq.f32.partialorder %v1581_v10, 8.507059e+37 }
 0x269   : > { %v1535_v48 = vmul.f32 %v1886_v11, %v1534_v32 }
 0x26b   : > { %v1536_v27 = vadd.f32 %v1886_v11, %v1535_v48 }
 0x26c   : > { %v1888_v36 = vpop.eup %1887 }
 0x26d   : > { %v1540_v7 = vsel %vm1539_vm4, %v1886_v11, %v1536_v27  ;;  %v1573_v14 = vmul.f32 %v1888_v36, %v1571_v24  ;;  %vm1578_vm6 = vweird.f32 %v1888_v36 }
 0x26e   : > { %v1545_v12 = vsel %vm1542_vm5, %v1544_v0, %v1540_v7  ;;  %vm1579_vm0 = vmor %vm1577_vm7, %vm1578_vm6 }
 0x26f   : > { %v1546_v22 = vmul.f32 %v1545_v12, %v1521_v6  ;;  %v1574_v41 = vsub.f32 1.0, %v1573_v14 }
 0x271   : > { %v1717_v45 = vclamps-f32 %v1546_v22, 1.0  ;;  %v1575_v16 = vmul.f32 %v1888_v36, %v1574_v41 }
 0x273   : > { %v1589_v57 = vadd.f32 1.0, %v1717_v45  ;;  %v1576_v20 = vadd.f32 %v1888_v36, %v1575_v16 }
 0x275   : > { %v1591_v23 = vmul.f32 %v1589_v57, %v1505_v62  ;;  %v1580_v39 = vsel %vm1579_vm0, %v1888_v36, %v1576_v20 }
 0x276   : > { %v1585_v1 = vsel %vm1582_vm8, %v1584_v18, %v1580_v39 }
 0x277   : > { %v1597_v51 = vmul.f32 %v1804_v8, %v1591_v23  ;;  %v1586_v40 = vmul.f32 %v1585_v1, %v1561_v42 }
 0x279   : > { %v1600_v44 = vsel %vm1599_vm9, %v1597_v51, 0.0  ;;  %v1718_v30 = vclamps-f32 %v1586_v40, 1.0 }
 0x27a   : > { %1601 = vadd.xlane.f32.xlu0 %v1600_v44 }
 0x27b   : > { %v1590_v53 = vadd.f32 1.0, %v1718_v30 }
 0x27d   : > { %v1592_v5 = vmul.f32 %v1590_v53, %v1506_v35 }
 0x27f   : > { %v1598_v52 = vmul.f32 %v1804_v8, %v1592_v5 }
 0x281   : > { %v1603_v9 = vsel %vm1599_vm9, %v1598_v52, 0.0 }
 0x282   : > { %1604 = vadd.xlane.f32.xlu0 %v1603_v9 }
 0x2ed   : > { %v1602_v21 = vpop.xlane.xlu0 %1601 }
 0x2ee   : > { %v1608_v17 = vadd.f32 %v1607_v63, %v1602_v21 }
 0x2f0   : > { %1610 = vst.msk [vmem:[%s3239_s7] sm:$0xff] %vm3308_vm11, %v1608_v17 }
 0x2f5   : > { %v1605_v46 = vpop.xlane.xlu0 %1604 }
 0x2f6   : > { %v1609_v43 = vadd.f32 %v1607_v63, %v1605_v46 }
 0x2f8   : > { %1611 = vst.msk [vmem:[%s3239_s7 + $0x8] sm:$0xff] %vm3309_vm12, %v1609_v43 }
 0x2f9 PF: > { %s18_s30 = sadd.s32 1, %s1927_s30   ;;  %s3310_s26 = smov %s1915_s27 }
 0x2fa   : > { %p15_p11 = scmp.ge.s32.totalorder %s18_s30, 5   ;;  %s3311_s27 = smov %s2010_s10 }
 0x2fb   : > { %s3312_s28 = smov %s1923_s29  ;;  %s3313_s29 = smov %s3315_s6 }
 0x2fc   :  { %17 = sbr.rel (!%p15_p11) target bundleno = 5 (0x5), region = 140 }

</bundles_post_ra>
